<compile_context>
chip_gen: v5e
topology: v5e:2x2
jax: 0.10.0
libtpu: 0.0.40
codegen_flags: <defaults>
</compile_context>

<pallas_src>
import functools
import math

import jax
import jax.numpy as jnp
import numpy as np
from jax.experimental import pallas as pl
from jax.experimental.pallas import tpu as pltpu


# ----------------------------------------------------------------------------
# Pallas kernel: channels-first matmul with fused bias + activation
# ----------------------------------------------------------------------------
def _cm_matmul_kernel(p_ref, w_ref, b_ref, o_ref, *, act):
    # p_ref: (1, K, tm) bf16   w_ref: (Cout, K) bf16   b_ref: (Cout, 1) f32
    acc = jnp.dot(w_ref[...], p_ref[0], preferred_element_type=jnp.float32)
    acc = acc + b_ref[...]                      # broadcast over lanes
    if act == "relu":
        acc = jnp.maximum(acc, 0.0)
    elif act == "sigmoid":
        acc = jax.nn.sigmoid(acc)
    o_ref[0] = acc


def _pick_tile(m):
    """Largest of (512, 256, 128) that divides m, else pad m up to 128s."""
    for tm in (512, 256, 128):
        if m % tm == 0:
            return tm, m
    tm = 128
    return tm, ((m + tm - 1) // tm) * tm


def _pad_lanes(a, Mp):
    M = a.shape[-1]
    if Mp == M:
        return a
    return jnp.pad(a, ((0, 0),) * (a.ndim - 1) + ((0, Mp - M),))


def matmul_cm(patches, wmat, bias, act=None):
    """(N, K, M) x (Cout, K) -> (N, Cout, M) with fused bias + activation."""
    N, K, M = patches.shape
    Cout = wmat.shape[0]
    tm, Mp = _pick_tile(M)
    patches = _pad_lanes(patches, Mp)

    p_bf = patches.astype(jnp.bfloat16)          # bf16 MXU operands
    w_bf = wmat.astype(jnp.bfloat16)
    b2 = bias.astype(jnp.float32).reshape(Cout, 1)

    out = pl.pallas_call(
        functools.partial(_cm_matmul_kernel, act=act),
        out_shape=jax.ShapeDtypeStruct((N, Cout, Mp), jnp.float32),
        grid=(N, Mp // tm),
        in_specs=[
            pl.BlockSpec((1, K, tm), lambda n, m: (n, 0, m)),
            pl.BlockSpec((Cout, K), lambda n, m: (0, 0)),
            pl.BlockSpec((Cout, 1), lambda n, m: (0, 0)),
        ],
        out_specs=pl.BlockSpec((1, Cout, tm), lambda n, m: (n, 0, m)),
        compiler_params=pltpu.CompilerParams(
            dimension_semantics=("parallel", "parallel")),
    )(p_bf, w_bf, b2)

    if Mp != M:
        out = out[:, :, :M]
    return out


# ----------------------------------------------------------------------------
# Pallas kernel: fused ESA tail
#   out = x * sigmoid( W4 @ (c3 + Wf @ c1_ + bf) + b4 )
# ----------------------------------------------------------------------------
def _esa_tail_kernel(c3_ref, c1_ref, x_ref, wf_ref, bf_ref, w4_ref, b4_ref,
                     o_ref):
    # c3_ref: (1, f, tm) f32   c1_ref: (1, f, tm) bf16   x_ref: (1, C, tm) f32
    # wf_ref: (f, f) bf16      bf_ref: (f, 1) f32
    # w4_ref: (C, f) bf16      b4_ref: (C, 1) f32
    cf = jnp.dot(wf_ref[...], c1_ref[0], preferred_element_type=jnp.float32)
    s = c3_ref[0] + cf + bf_ref[...]
    c4 = jnp.dot(w4_ref[...], s.astype(jnp.bfloat16),
                 preferred_element_type=jnp.float32) + b4_ref[...]
    o_ref[0] = x_ref[0] * jax.nn.sigmoid(c4)


def esa_tail(c3, c1_, x, pf, p4):
    """Fused conv_f + add + conv4 + sigmoid + gating multiply (all 1x1)."""
    N, C, H, W = x.shape
    f = c3.shape[1]
    M = H * W
    tm, Mp = _pick_tile(M)

    c3f = _pad_lanes(c3.reshape(N, f, M).astype(jnp.float32), Mp)
    c1b = _pad_lanes(c1_.reshape(N, f, M).astype(jnp.bfloat16), Mp)
    xf = _pad_lanes(x.reshape(N, C, M).astype(jnp.float32), Mp)

    wf = pf["w"].reshape(f, f).astype(jnp.bfloat16)
    bf = pf["b"].astype(jnp.float32).reshape(f, 1)
    w4 = p4["w"].reshape(C, f).astype(jnp.bfloat16)
    b4 = p4["b"].astype(jnp.float32).reshape(C, 1)

    out = pl.pallas_call(
        _esa_tail_kernel,
        out_shape=jax.ShapeDtypeStruct((N, C, Mp), jnp.float32),
        grid=(N, Mp // tm),
        in_specs=[
            pl.BlockSpec((1, f, tm), lambda n, m: (n, 0, m)),
            pl.BlockSpec((1, f, tm), lambda n, m: (n, 0, m)),
            pl.BlockSpec((1, C, tm), lambda n, m: (n, 0, m)),
            pl.BlockSpec((f, f), lambda n, m: (0, 0)),
            pl.BlockSpec((f, 1), lambda n, m: (0, 0)),
            pl.BlockSpec((C, f), lambda n, m: (0, 0)),
            pl.BlockSpec((C, 1), lambda n, m: (0, 0)),
        ],
        out_specs=pl.BlockSpec((1, C, tm), lambda n, m: (n, 0, m)),
        compiler_params=pltpu.CompilerParams(
            dimension_semantics=("parallel", "parallel")),
    )(c3f, c1b, xf, wf, bf, w4, b4)

    if Mp != M:
        out = out[:, :, :M]
    return out.reshape(N, C, H, W)


# ----------------------------------------------------------------------------
# Conv / pooling glue (NCHW, channels-first flat)
# ----------------------------------------------------------------------------
def conv2d(x, p, stride=1, padding=0, act=None):
    """NCHW conv with PyTorch-layout weight (Cout, Cin, kh, kw) via Pallas."""
    w, b = p["w"], p["b"]
    N, Cin, H, W = x.shape
    Cout, _, kh, kw = w.shape
    if kh == 1 and kw == 1 and stride == 1 and padding == 0:
        patches = x.reshape(N, Cin, H * W)
        Ho, Wo = H, W
    else:
        xp = x if padding == 0 else jnp.pad(
            x, ((0, 0), (0, 0), (padding, padding), (padding, padding)))
        Ho = (H + 2 * padding - kh) // stride + 1
        Wo = (W + 2 * padding - kw) // stride + 1
        cols = []
        for i in range(kh):
            for j in range(kw):
                cols.append(
                    xp[:, :, i:i + stride * Ho:stride, j:j + stride * Wo:stride])
        # ordering (Cin, tap) matches w.reshape(Cout, Cin*kh*kw)
        patches = jnp.stack(cols, axis=2).reshape(N, Cin * kh * kw, Ho * Wo)
    wm = w.reshape(Cout, Cin * kh * kw)
    out = matmul_cm(patches, wm, b, act=act)
    return out.reshape(N, Cout, Ho, Wo)


def max_pool2d(x, k, s):
    return jax.lax.reduce_window(
        x, -jnp.inf, jax.lax.max, (1, 1, k, k), (1, 1, s, s), "VALID")


# ----------------------------------------------------------------------------
# ESA forward (Pallas path)
# ----------------------------------------------------------------------------
def esa_forward(x, p):
    N, C, H, W = x.shape
    c1_ = conv2d(x, p["conv1"])                                # 1x1
    c1 = conv2d(c1_, p["conv2"], stride=2, padding=0)          # 3x3 s2 p0
    v_max = max_pool2d(c1, 7, 3)
    v_range = conv2d(v_max, p["conv_max"], padding=1, act="relu")
    c3 = conv2d(v_range, p["conv3"], padding=1, act="relu")
    c3 = conv2d(c3, p["conv3_"], padding=1)
    c3 = jax.image.resize(c3, (N, c3.shape[1], H, W), method="bilinear")
    # fused: conv_f(c1_) + add + conv4 + sigmoid + x * m
    return esa_tail(c3, c1_, x, p["conv_f"], p["conv4"])


# ----------------------------------------------------------------------------
# Pure-JAX reference (for correctness check)
# ----------------------------------------------------------------------------
def _conv_ref(x, p, stride=1, padding=0):
    out = jax.lax.conv_general_dilated(
        x, p["w"], window_strides=(stride, stride),
        padding=((padding, padding), (padding, padding)),
        dimension_numbers=("NCHW", "OIHW", "NCHW"))
    return out + p["b"].reshape(1, -1, 1, 1)


def esa_ref(x, p):
    N, C, H, W = x.shape
    c1_ = _conv_ref(x, p["conv1"])
    c1 = _conv_ref(c1_, p["conv2"], stride=2, padding=0)
    v_max = max_pool2d(c1, 7, 3)
    v_range = jax.nn.relu(_conv_ref(v_max, p["conv_max"], padding=1))
    c3 = jax.nn.relu(_conv_ref(v_range, p["conv3"], padding=1))
    c3 = _conv_ref(c3, p["conv3_"], padding=1)
    c3 = jax.image.resize(c3, (N, c3.shape[1], H, W), method="bilinear")
    cf = _conv_ref(c1_, p["conv_f"])
    m = jax.nn.sigmoid(_conv_ref(c3 + cf, p["conv4"]))
    return x * m


# ----------------------------------------------------------------------------
# Deterministic parameter construction (PyTorch weight layout: OIHW)
# ----------------------------------------------------------------------------
def conv_p(key, cout, cin, k):
    k1, k2 = jax.random.split(key)
    fan = cin * k * k
    return {"w": jax.random.normal(k1, (cout, cin, k, k), jnp.float32)
                 / math.sqrt(fan),
            "b": jax.random.normal(k2, (cout,), jnp.float32) * 0.05}


def esa_params(key, n_feats):
    f = n_feats // 4
    ks = jax.random.split(key, 7)
    return {"conv1":    conv_p(ks[0], f, n_feats, 1),
            "conv_f":   conv_p(ks[1], f, f, 1),
            "conv_max": conv_p(ks[2], f, f, 3),
            "conv2":    conv_p(ks[3], f, f, 3),
            "conv3":    conv_p(ks[4], f, f, 3),
            "conv3_":   conv_p(ks[5], f, f, 3),
            "conv4":    conv_p(ks[6], n_feats, f, 1)}


# ----------------------------------------------------------------------------
if __name__ == "__main__":
    key = jax.random.PRNGKey(0)
    pkey, xkey = jax.random.split(key)

    n_feats, N, H, W = 32, 2, 32, 32
    params = esa_params(pkey, n_feats)
    x = jax.random.uniform(xkey, (N, n_feats, H, W), jnp.float32)  # NCHW

    esa_jit = jax.jit(esa_forward)            # single outer jit for the whole fwd
    out = jax.block_until_ready(esa_jit(x, params))

    assert out.shape == (N, n_feats, H, W), out.shape
    assert bool(jnp.all(jnp.isfinite(out)))

    ref = jax.block_until_ready(jax.jit(esa_ref)(x, params))
    np.testing.assert_allclose(np.asarray(out), np.asarray(ref),
                               atol=3e-2, rtol=3e-2)
    print("KERNEL_OK")
</pallas_src>

<mosaic_0001>
module attributes {stable_mosaic.version = 11 : i64} {
  func.func @_cm_matmul_kernel(%arg0: i32, %arg1: i32, %arg2: memref<1x32x512xbf16, #tpu.memory_space<vmem>>, %arg3: memref<8x32xbf16, #tpu.memory_space<vmem>>, %arg4: memref<8x1xf32, #tpu.memory_space<vmem>>, %arg5: memref<1x8x512xf32, #tpu.memory_space<vmem>>) attributes {dimension_semantics = [#tpu.dimension_semantics<parallel>, #tpu.dimension_semantics<parallel>], iteration_bounds = array<i64: 2, 2>, scalar_prefetch = 0 : i64, scratch_operands = 0 : i64, tpu.core_type = #tpu.core_type<tc>, window_params = [{transform_indices = @transform_0, window_bounds = array<i64: 1, 32, 512>}, {pipeline_mode = #tpu.pipeline_mode<synchronous>, transform_indices = @transform_1, window_bounds = array<i64: 8, 32>}, {pipeline_mode = #tpu.pipeline_mode<synchronous>, transform_indices = @transform_2, window_bounds = array<i64: 8, 1>}, {transform_indices = @transform_3, window_bounds = array<i64: 1, 8, 512>}]} {
    %c0 = arith.constant 0 : index
    %c0_0 = arith.constant 0 : index
    %0 = vector.load %arg3[%c0, %c0_0] : memref<8x32xbf16, #tpu.memory_space<vmem>>, vector<8x32xbf16>
    %c0_1 = arith.constant 0 : index
    %c0_2 = arith.constant 0 : index
    %c0_3 = arith.constant 0 : index
    %1 = vector.load %arg2[%c0_1, %c0_2, %c0_3] : memref<1x32x512xbf16, #tpu.memory_space<vmem>>, vector<1x32x512xbf16>
    %2 = vector.shape_cast %1 : vector<1x32x512xbf16> to vector<32x512xbf16>
    %cst = arith.constant dense<0.000000e+00> : vector<8x512xf32>
    %3 = tpu.matmul %0, %2, %cst {dimension_numbers = #tpu.dot_dimension_numbers<[1], [0], [0], [1], [0, 0, 1, 1], [], []>} : vector<8x32xbf16>, vector<32x512xbf16>, vector<8x512xf32> -> vector<8x512xf32>
    %c0_4 = arith.constant 0 : index
    %c0_5 = arith.constant 0 : index
    %4 = vector.load %arg4[%c0_4, %c0_5] : memref<8x1xf32, #tpu.memory_space<vmem>>, vector<8x1xf32>
    %5 = vector.broadcast %4 : vector<8x1xf32> to vector<8x512xf32>
    %6 = arith.addf %3, %5 : vector<8x512xf32>
    %c0_6 = arith.constant 0 : index
    %c0_7 = arith.constant 0 : index
    %c0_8 = arith.constant 0 : index
    %7 = vector.load %arg5[%c0_6, %c0_7, %c0_8] : memref<1x8x512xf32, #tpu.memory_space<vmem>>, vector<1x8x512xf32>
    %8 = vector.shape_cast %7 : vector<1x8x512xf32> to vector<8x512xf32>
    %9 = vector.shape_cast %6 : vector<8x512xf32> to vector<1x8x512xf32>
    tpu.vector_store %arg5[%c0_6, %c0_7, %c0_8], %9 {strides = array<i32>} : memref<1x8x512xf32, #tpu.memory_space<vmem>>, vector<1x8x512xf32>,
    return
  }
  func.func @transform_0(%arg0: i32, %arg1: i32) -> (i32, i32, i32) {
    %c0_i32 = arith.constant 0 : i32
    %c0_i32_0 = arith.constant 0 : i32
    return %arg0, %c0_i32, %arg1 : i32, i32, i32
  }
  func.func @transform_1(%arg0: i32, %arg1: i32) -> (i32, i32) {
    %c0_i32 = arith.constant 0 : i32
    %c0_i32_0 = arith.constant 0 : i32
    %c0_i32_1 = arith.constant 0 : i32
    return %c0_i32, %c0_i32_0 : i32, i32
  }
  func.func @transform_2(%arg0: i32, %arg1: i32) -> (i32, i32) {
    %c0_i32 = arith.constant 0 : i32
    %c0_i32_0 = arith.constant 0 : i32
    %c0_i32_1 = arith.constant 0 : i32
    return %c0_i32, %c0_i32_0 : i32, i32
  }
  func.func @transform_3(%arg0: i32, %arg1: i32) -> (i32, i32, i32) {
    %c0_i32 = arith.constant 0 : i32
    %c0_i32_0 = arith.constant 0 : i32
    return %arg0, %c0_i32, %arg1 : i32, i32, i32
  }
}

module attributes {stable_mosaic.version = 11 : i64} {
  func.func @_cm_matmul_kernel(%arg0: i32, %arg1: i32, %arg2: memref<1x72x128xbf16, #tpu.memory_space<vmem>>, %arg3: memref<8x72xbf16, #tpu.memory_space<vmem>>, %arg4: memref<8x1xf32, #tpu.memory_space<vmem>>, %arg5: memref<1x8x128xf32, #tpu.memory_space<vmem>>) attributes {dimension_semantics = [#tpu.dimension_semantics<parallel>, #tpu.dimension_semantics<parallel>], iteration_bounds = array<i64: 2, 2>, scalar_prefetch = 0 : i64, scratch_operands = 0 : i64, tpu.core_type = #tpu.core_type<tc>, window_params = [{transform_indices = @transform_0, window_bounds = array<i64: 1, 72, 128>}, {pipeline_mode = #tpu.pipeline_mode<synchronous>, transform_indices = @transform_1, window_bounds = array<i64: 8, 72>}, {pipeline_mode = #tpu.pipeline_mode<synchronous>, transform_indices = @transform_2, window_bounds = array<i64: 8, 1>}, {transform_indices = @transform_3, window_bounds = array<i64: 1, 8, 128>}]} {
    %c0 = arith.constant 0 : index
    %c0_0 = arith.constant 0 : index
    %0 = vector.load %arg3[%c0, %c0_0] : memref<8x72xbf16, #tpu.memory_space<vmem>>, vector<8x72xbf16>
    %c0_1 = arith.constant 0 : index
    %c0_2 = arith.constant 0 : index
    %c0_3 = arith.constant 0 : index
    %1 = vector.load %arg2[%c0_1, %c0_2, %c0_3] : memref<1x72x128xbf16, #tpu.memory_space<vmem>>, vector<1x72x128xbf16>
    %2 = vector.shape_cast %1 : vector<1x72x128xbf16> to vector<72x128xbf16>
    %cst = arith.constant dense<0.000000e+00> : vector<8x128xf32>
    %3 = tpu.matmul %0, %2, %cst {dimension_numbers = #tpu.dot_dimension_numbers<[1], [0], [0], [1], [0, 0, 1, 1], [], []>} : vector<8x72xbf16>, vector<72x128xbf16>, vector<8x128xf32> -> vector<8x128xf32>
    %c0_4 = arith.constant 0 : index
    %c0_5 = arith.constant 0 : index
    %4 = vector.load %arg4[%c0_4, %c0_5] : memref<8x1xf32, #tpu.memory_space<vmem>>, vector<8x1xf32>
    %5 = vector.broadcast %4 : vector<8x1xf32> to vector<8x128xf32>
    %6 = arith.addf %3, %5 : vector<8x128xf32>
    %c0_6 = arith.constant 0 : index
    %c0_7 = arith.constant 0 : index
    %c0_8 = arith.constant 0 : index
    %7 = vector.load %arg5[%c0_6, %c0_7, %c0_8] : memref<1x8x128xf32, #tpu.memory_space<vmem>>, vector<1x8x128xf32>
    %8 = vector.shape_cast %7 : vector<1x8x128xf32> to vector<8x128xf32>
    %9 = vector.shape_cast %6 : vector<8x128xf32> to vector<1x8x128xf32>
    tpu.vector_store %arg5[%c0_6, %c0_7, %c0_8], %9 {strides = array<i32>} : memref<1x8x128xf32, #tpu.memory_space<vmem>>, vector<1x8x128xf32>,
    return
  }
  func.func @transform_0(%arg0: i32, %arg1: i32) -> (i32, i32, i32) {
    %c0_i32 = arith.constant 0 : i32
    %c0_i32_0 = arith.constant 0 : i32
    return %arg0, %c0_i32, %arg1 : i32, i32, i32
  }
  func.func @transform_1(%arg0: i32, %arg1: i32) -> (i32, i32) {
    %c0_i32 = arith.constant 0 : i32
    %c0_i32_0 = arith.constant 0 : i32
    %c0_i32_1 = arith.constant 0 : i32
    return %c0_i32, %c0_i32_0 : i32, i32
  }
  func.func @transform_2(%arg0: i32, %arg1: i32) -> (i32, i32) {
    %c0_i32 = arith.constant 0 : i32
    %c0_i32_0 = arith.constant 0 : i32
    %c0_i32_1 = arith.constant 0 : i32
    return %c0_i32, %c0_i32_0 : i32, i32
  }
  func.func @transform_3(%arg0: i32, %arg1: i32) -> (i32, i32, i32) {
    %c0_i32 = arith.constant 0 : i32
    %c0_i32_0 = arith.constant 0 : i32
    return %arg0, %c0_i32, %arg1 : i32, i32, i32
  }
}

module attributes {stable_mosaic.version = 11 : i64} {
  func.func @_cm_matmul_kernel(%arg0: i32, %arg1: i32, %arg2: memref<1x72x128xbf16, #tpu.memory_space<vmem>>, %arg3: memref<8x72xbf16, #tpu.memory_space<vmem>>, %arg4: memref<8x1xf32, #tpu.memory_space<vmem>>, %arg5: memref<1x8x128xf32, #tpu.memory_space<vmem>>) attributes {dimension_semantics = [#tpu.dimension_semantics<parallel>, #tpu.dimension_semantics<parallel>], iteration_bounds = array<i64: 2, 1>, scalar_prefetch = 0 : i64, scratch_operands = 0 : i64, tpu.core_type = #tpu.core_type<tc>, window_params = [{transform_indices = @transform_0, window_bounds = array<i64: 1, 72, 128>}, {pipeline_mode = #tpu.pipeline_mode<synchronous>, transform_indices = @transform_1, window_bounds = array<i64: 8, 72>}, {pipeline_mode = #tpu.pipeline_mode<synchronous>, transform_indices = @transform_2, window_bounds = array<i64: 8, 1>}, {transform_indices = @transform_3, window_bounds = array<i64: 1, 8, 128>}]} {
    %c0 = arith.constant 0 : index
    %c0_0 = arith.constant 0 : index
    %0 = vector.load %arg3[%c0, %c0_0] : memref<8x72xbf16, #tpu.memory_space<vmem>>, vector<8x72xbf16>
    %c0_1 = arith.constant 0 : index
    %c0_2 = arith.constant 0 : index
    %c0_3 = arith.constant 0 : index
    %1 = vector.load %arg2[%c0_1, %c0_2, %c0_3] : memref<1x72x128xbf16, #tpu.memory_space<vmem>>, vector<1x72x128xbf16>
    %2 = vector.shape_cast %1 : vector<1x72x128xbf16> to vector<72x128xbf16>
    %cst = arith.constant dense<0.000000e+00> : vector<8x128xf32>
    %3 = tpu.matmul %0, %2, %cst {dimension_numbers = #tpu.dot_dimension_numbers<[1], [0], [0], [1], [0, 0, 1, 1], [], []>} : vector<8x72xbf16>, vector<72x128xbf16>, vector<8x128xf32> -> vector<8x128xf32>
    %c0_4 = arith.constant 0 : index
    %c0_5 = arith.constant 0 : index
    %4 = vector.load %arg4[%c0_4, %c0_5] : memref<8x1xf32, #tpu.memory_space<vmem>>, vector<8x1xf32>
    %5 = vector.broadcast %4 : vector<8x1xf32> to vector<8x128xf32>
    %6 = arith.addf %3, %5 : vector<8x128xf32>
    %cst_6 = arith.constant 0.000000e+00 : f32
    %7 = vector.broadcast %cst_6 : f32 to vector<8x128xf32>
    %8 = arith.maximumf %6, %7 : vector<8x128xf32>
    %c0_7 = arith.constant 0 : index
    %c0_8 = arith.constant 0 : index
    %c0_9 = arith.constant 0 : index
    %9 = vector.load %arg5[%c0_7, %c0_8, %c0_9] : memref<1x8x128xf32, #tpu.memory_space<vmem>>, vector<1x8x128xf32>
    %10 = vector.shape_cast %9 : vector<1x8x128xf32> to vector<8x128xf32>
    %11 = vector.shape_cast %8 : vector<8x128xf32> to vector<1x8x128xf32>
    tpu.vector_store %arg5[%c0_7, %c0_8, %c0_9], %11 {strides = array<i32>} : memref<1x8x128xf32, #tpu.memory_space<vmem>>, vector<1x8x128xf32>,
    return
  }
  func.func @transform_0(%arg0: i32, %arg1: i32) -> (i32, i32, i32) {
    %c0_i32 = arith.constant 0 : i32
    %c0_i32_0 = arith.constant 0 : i32
    return %arg0, %c0_i32, %arg1 : i32, i32, i32
  }
  func.func @transform_1(%arg0: i32, %arg1: i32) -> (i32, i32) {
    %c0_i32 = arith.constant 0 : i32
    %c0_i32_0 = arith.constant 0 : i32
    %c0_i32_1 = arith.constant 0 : i32
    return %c0_i32, %c0_i32_0 : i32, i32
  }
  func.func @transform_2(%arg0: i32, %arg1: i32) -> (i32, i32) {
    %c0_i32 = arith.constant 0 : i32
    %c0_i32_0 = arith.constant 0 : i32
    %c0_i32_1 = arith.constant 0 : i32
    return %c0_i32, %c0_i32_0 : i32, i32
  }
  func.func @transform_3(%arg0: i32, %arg1: i32) -> (i32, i32, i32) {
    %c0_i32 = arith.constant 0 : i32
    %c0_i32_0 = arith.constant 0 : i32
    return %arg0, %c0_i32, %arg1 : i32, i32, i32
  }
}

module attributes {stable_mosaic.version = 11 : i64} {
  func.func @_cm_matmul_kernel(%arg0: i32, %arg1: i32, %arg2: memref<1x72x128xbf16, #tpu.memory_space<vmem>>, %arg3: memref<8x72xbf16, #tpu.memory_space<vmem>>, %arg4: memref<8x1xf32, #tpu.memory_space<vmem>>, %arg5: memref<1x8x128xf32, #tpu.memory_space<vmem>>) attributes {dimension_semantics = [#tpu.dimension_semantics<parallel>, #tpu.dimension_semantics<parallel>], iteration_bounds = array<i64: 2, 1>, scalar_prefetch = 0 : i64, scratch_operands = 0 : i64, tpu.core_type = #tpu.core_type<tc>, window_params = [{transform_indices = @transform_0, window_bounds = array<i64: 1, 72, 128>}, {pipeline_mode = #tpu.pipeline_mode<synchronous>, transform_indices = @transform_1, window_bounds = array<i64: 8, 72>}, {pipeline_mode = #tpu.pipeline_mode<synchronous>, transform_indices = @transform_2, window_bounds = array<i64: 8, 1>}, {transform_indices = @transform_3, window_bounds = array<i64: 1, 8, 128>}]} {
    %c0 = arith.constant 0 : index
    %c0_0 = arith.constant 0 : index
    %0 = vector.load %arg3[%c0, %c0_0] : memref<8x72xbf16, #tpu.memory_space<vmem>>, vector<8x72xbf16>
    %c0_1 = arith.constant 0 : index
    %c0_2 = arith.constant 0 : index
    %c0_3 = arith.constant 0 : index
    %1 = vector.load %arg2[%c0_1, %c0_2, %c0_3] : memref<1x72x128xbf16, #tpu.memory_space<vmem>>, vector<1x72x128xbf16>
    %2 = vector.shape_cast %1 : vector<1x72x128xbf16> to vector<72x128xbf16>
    %cst = arith.constant dense<0.000000e+00> : vector<8x128xf32>
    %3 = tpu.matmul %0, %2, %cst {dimension_numbers = #tpu.dot_dimension_numbers<[1], [0], [0], [1], [0, 0, 1, 1], [], []>} : vector<8x72xbf16>, vector<72x128xbf16>, vector<8x128xf32> -> vector<8x128xf32>
    %c0_4 = arith.constant 0 : index
    %c0_5 = arith.constant 0 : index
    %4 = vector.load %arg4[%c0_4, %c0_5] : memref<8x1xf32, #tpu.memory_space<vmem>>, vector<8x1xf32>
    %5 = vector.broadcast %4 : vector<8x1xf32> to vector<8x128xf32>
    %6 = arith.addf %3, %5 : vector<8x128xf32>
    %c0_6 = arith.constant 0 : index
    %c0_7 = arith.constant 0 : index
    %c0_8 = arith.constant 0 : index
    %7 = vector.load %arg5[%c0_6, %c0_7, %c0_8] : memref<1x8x128xf32, #tpu.memory_space<vmem>>, vector<1x8x128xf32>
    %8 = vector.shape_cast %7 : vector<1x8x128xf32> to vector<8x128xf32>
    %9 = vector.shape_cast %6 : vector<8x128xf32> to vector<1x8x128xf32>
    tpu.vector_store %arg5[%c0_6, %c0_7, %c0_8], %9 {strides = array<i32>} : memref<1x8x128xf32, #tpu.memory_space<vmem>>, vector<1x8x128xf32>,
    return
  }
  func.func @transform_0(%arg0: i32, %arg1: i32) -> (i32, i32, i32) {
    %c0_i32 = arith.constant 0 : i32
    %c0_i32_0 = arith.constant 0 : i32
    return %arg0, %c0_i32, %arg1 : i32, i32, i32
  }
  func.func @transform_1(%arg0: i32, %arg1: i32) -> (i32, i32) {
    %c0_i32 = arith.constant 0 : i32
    %c0_i32_0 = arith.constant 0 : i32
    %c0_i32_1 = arith.constant 0 : i32
    return %c0_i32, %c0_i32_0 : i32, i32
  }
  func.func @transform_2(%arg0: i32, %arg1: i32) -> (i32, i32) {
    %c0_i32 = arith.constant 0 : i32
    %c0_i32_0 = arith.constant 0 : i32
    %c0_i32_1 = arith.constant 0 : i32
    return %c0_i32, %c0_i32_0 : i32, i32
  }
  func.func @transform_3(%arg0: i32, %arg1: i32) -> (i32, i32, i32) {
    %c0_i32 = arith.constant 0 : i32
    %c0_i32_0 = arith.constant 0 : i32
    return %arg0, %c0_i32, %arg1 : i32, i32, i32
  }
}

module attributes {stable_mosaic.version = 11 : i64} {
  func.func @_esa_tail_kernel(%arg0: i32, %arg1: i32, %arg2: memref<1x8x512xf32, #tpu.memory_space<vmem>>, %arg3: memref<1x8x512xbf16, #tpu.memory_space<vmem>>, %arg4: memref<1x32x512xf32, #tpu.memory_space<vmem>>, %arg5: memref<8x8xbf16, #tpu.memory_space<vmem>>, %arg6: memref<8x1xf32, #tpu.memory_space<vmem>>, %arg7: memref<32x8xbf16, #tpu.memory_space<vmem>>, %arg8: memref<32x1xf32, #tpu.memory_space<vmem>>, %arg9: memref<1x32x512xf32, #tpu.memory_space<vmem>>) attributes {dimension_semantics = [#tpu.dimension_semantics<parallel>, #tpu.dimension_semantics<parallel>], iteration_bounds = array<i64: 2, 2>, scalar_prefetch = 0 : i64, scratch_operands = 0 : i64, tpu.core_type = #tpu.core_type<tc>, window_params = [{transform_indices = @transform_0, window_bounds = array<i64: 1, 8, 512>}, {transform_indices = @transform_1, window_bounds = array<i64: 1, 8, 512>}, {transform_indices = @transform_2, window_bounds = array<i64: 1, 32, 512>}, {pipeline_mode = #tpu.pipeline_mode<synchronous>, transform_indices = @transform_3, window_bounds = array<i64: 8, 8>}, {pipeline_mode = #tpu.pipeline_mode<synchronous>, transform_indices = @transform_4, window_bounds = array<i64: 8, 1>}, {pipeline_mode = #tpu.pipeline_mode<synchronous>, transform_indices = @transform_5, window_bounds = array<i64: 32, 8>}, {pipeline_mode = #tpu.pipeline_mode<synchronous>, transform_indices = @transform_6, window_bounds = array<i64: 32, 1>}, {transform_indices = @transform_7, window_bounds = array<i64: 1, 32, 512>}]} {
    %c0 = arith.constant 0 : index
    %c0_0 = arith.constant 0 : index
    %0 = vector.load %arg5[%c0, %c0_0] : memref<8x8xbf16, #tpu.memory_space<vmem>>, vector<8x8xbf16>
    %c0_1 = arith.constant 0 : index
    %c0_2 = arith.constant 0 : index
    %c0_3 = arith.constant 0 : index
    %1 = vector.load %arg3[%c0_1, %c0_2, %c0_3] : memref<1x8x512xbf16, #tpu.memory_space<vmem>>, vector<1x8x512xbf16>
    %2 = vector.shape_cast %1 : vector<1x8x512xbf16> to vector<8x512xbf16>
    %cst = arith.constant dense<0.000000e+00> : vector<8x512xf32>
    %3 = tpu.matmul %0, %2, %cst {dimension_numbers = #tpu.dot_dimension_numbers<[1], [0], [0], [1], [0, 0, 1, 1], [], []>} : vector<8x8xbf16>, vector<8x512xbf16>, vector<8x512xf32> -> vector<8x512xf32>
    %c0_4 = arith.constant 0 : index
    %c0_5 = arith.constant 0 : index
    %c0_6 = arith.constant 0 : index
    %4 = vector.load %arg2[%c0_4, %c0_5, %c0_6] : memref<1x8x512xf32, #tpu.memory_space<vmem>>, vector<1x8x512xf32>
    %5 = vector.shape_cast %4 : vector<1x8x512xf32> to vector<8x512xf32>
    %6 = arith.addf %5, %3 : vector<8x512xf32>
    %c0_7 = arith.constant 0 : index
    %c0_8 = arith.constant 0 : index
    %7 = vector.load %arg6[%c0_7, %c0_8] : memref<8x1xf32, #tpu.memory_space<vmem>>, vector<8x1xf32>
    %8 = vector.broadcast %7 : vector<8x1xf32> to vector<8x512xf32>
    %9 = arith.addf %6, %8 : vector<8x512xf32>
    %c0_9 = arith.constant 0 : index
    %c0_10 = arith.constant 0 : index
    %10 = vector.load %arg7[%c0_9, %c0_10] : memref<32x8xbf16, #tpu.memory_space<vmem>>, vector<32x8xbf16>
    %11 = arith.truncf %9 : vector<8x512xf32> to vector<8x512xbf16>
    %cst_11 = arith.constant dense<0.000000e+00> : vector<32x512xf32>
    %12 = tpu.matmul %10, %11, %cst_11 {dimension_numbers = #tpu.dot_dimension_numbers<[1], [0], [0], [1], [0, 0, 1, 1], [], []>} : vector<32x8xbf16>, vector<8x512xbf16>, vector<32x512xf32> -> vector<32x512xf32>
    %c0_12 = arith.constant 0 : index
    %c0_13 = arith.constant 0 : index
    %13 = vector.load %arg8[%c0_12, %c0_13] : memref<32x1xf32, #tpu.memory_space<vmem>>, vector<32x1xf32>
    %14 = vector.broadcast %13 : vector<32x1xf32> to vector<32x512xf32>
    %15 = arith.addf %12, %14 : vector<32x512xf32>
    %c0_14 = arith.constant 0 : index
    %c0_15 = arith.constant 0 : index
    %c0_16 = arith.constant 0 : index
    %16 = vector.load %arg4[%c0_14, %c0_15, %c0_16] : memref<1x32x512xf32, #tpu.memory_space<vmem>>, vector<1x32x512xf32>
    %17 = vector.shape_cast %16 : vector<1x32x512xf32> to vector<32x512xf32>
    %18 = arith.negf %15 : vector<32x512xf32>
    %19 = math.exp %18 : vector<32x512xf32>
    %cst_17 = arith.constant 1.000000e+00 : f32
    %20 = vector.broadcast %cst_17 : f32 to vector<32x512xf32>
    %21 = arith.addf %20, %19 : vector<32x512xf32>
    %22 = arith.divf %20, %21 : vector<32x512xf32>
    %23 = arith.mulf %17, %22 : vector<32x512xf32>
    %c0_18 = arith.constant 0 : index
    %c0_19 = arith.constant 0 : index
    %c0_20 = arith.constant 0 : index
    %24 = vector.load %arg9[%c0_18, %c0_19, %c0_20] : memref<1x32x512xf32, #tpu.memory_space<vmem>>, vector<1x32x512xf32>
    %25 = vector.shape_cast %24 : vector<1x32x512xf32> to vector<32x512xf32>
    %26 = vector.shape_cast %23 : vector<32x512xf32> to vector<1x32x512xf32>
    tpu.vector_store %arg9[%c0_18, %c0_19, %c0_20], %26 {strides = array<i32>} : memref<1x32x512xf32, #tpu.memory_space<vmem>>, vector<1x32x512xf32>,
    return
  }
  func.func @transform_0(%arg0: i32, %arg1: i32) -> (i32, i32, i32) {
    %c0_i32 = arith.constant 0 : i32
    %c0_i32_0 = arith.constant 0 : i32
    return %arg0, %c0_i32, %arg1 : i32, i32, i32
  }
  func.func @transform_1(%arg0: i32, %arg1: i32) -> (i32, i32, i32) {
    %c0_i32 = arith.constant 0 : i32
    %c0_i32_0 = arith.constant 0 : i32
    return %arg0, %c0_i32, %arg1 : i32, i32, i32
  }
  func.func @transform_2(%arg0: i32, %arg1: i32) -> (i32, i32, i32) {
    %c0_i32 = arith.constant 0 : i32
    %c0_i32_0 = arith.constant 0 : i32
    return %arg0, %c0_i32, %arg1 : i32, i32, i32
  }
  func.func @transform_3(%arg0: i32, %arg1: i32) -> (i32, i32) {
    %c0_i32 = arith.constant 0 : i32
    %c0_i32_0 = arith.constant 0 : i32
    %c0_i32_1 = arith.constant 0 : i32
    return %c0_i32, %c0_i32_0 : i32, i32
  }
  func.func @transform_4(%arg0: i32, %arg1: i32) -> (i32, i32) {
    %c0_i32 = arith.constant 0 : i32
    %c0_i32_0 = arith.constant 0 : i32
    %c0_i32_1 = arith.constant 0 : i32
    return %c0_i32, %c0_i32_0 : i32, i32
  }
  func.func @transform_5(%arg0: i32, %arg1: i32) -> (i32, i32) {
    %c0_i32 = arith.constant 0 : i32
    %c0_i32_0 = arith.constant 0 : i32
    %c0_i32_1 = arith.constant 0 : i32
    return %c0_i32, %c0_i32_0 : i32, i32
  }
  func.func @transform_6(%arg0: i32, %arg1: i32) -> (i32, i32) {
    %c0_i32 = arith.constant 0 : i32
    %c0_i32_0 = arith.constant 0 : i32
    %c0_i32_1 = arith.constant 0 : i32
    return %c0_i32, %c0_i32_0 : i32, i32
  }
  func.func @transform_7(%arg0: i32, %arg1: i32) -> (i32, i32, i32) {
    %c0_i32 = arith.constant 0 : i32
    %c0_i32_0 = arith.constant 0 : i32
    return %arg0, %c0_i32, %arg1 : i32, i32, i32
  }
}

</mosaic_0001>

<bundles_post_ra>
// kernel: esa_forward.6
= control target key start
LH: loop header
LB: loop body
LE: loop exit
PB: predicated region body
PF: predicated region fallthrough
CT: control target
= control target key end

     0   :  { %s636_s12 = smov 0   ;;  %s638_s13 = smov 0   ;;  %s732_s0 = inlined_call_operand.vmem [shape: bf16[2,32,1024], index: 0, kind: input, shape index: {}]   ;;  %s733_s1 = inlined_call_operand.vmem [shape: bf16[8,32], index: 1, kind: input, shape index: {}]   ;;  %s734_s2 = inlined_call_operand.vmem [shape: f32[8,1], index: 2, kind: input, shape index: {}]   ;;  %s735_s3 = inlined_call_operand.vmem [shape: f32[2,8,1024], index: 3, kind: output, shape index: {}]  }
   0x1   :  { %s640_s14 = smov 0   ;;  %s642_s15 = smov 0  }
   0x2   :  { %s644_s16 = smov 0   ;;  %s646_s17 = smov 0  }
   0x3   :  { %s648_s18 = smov 0  }
   0x4 LB: > { %s22_s19 = sadd.s32 1, %s605_s16  ;;  %s25_s20 = sadd.s32 1, %s609_s17  ;;  %s613_s18 = sphi %s648_s18, %s13_s18   ;;  %s609_s17 = sphi %s646_s17, %s741_s17   ;;  %s605_s16 = sphi %s644_s16, %s740_s16   ;;  %s601_s15 = sphi %s642_s15, %s739_s15   ;;  %s597_s14 = sphi %s640_s14, %s738_s14   ;;  %s593_s13 = sphi %s638_s13, %s737_s13   ;;  %s589_s12 = sphi %s636_s12, %s736_s12  }
   0x5   : > { %p23_p0 = scmp.ge.s32.totalorder %s22_s19, 2  ;;  %p41_p1 = scmp.ne.s32.totalorder %s593_s13, %s589_s12 }
   0x6   : > { %p42_p2 = scmp.eq.s32.totalorder %s613_s18, 0  ;;  %s34_s24 = sadd.s32 1, %s593_s13 }
   0x7   : > { %s743_s19 = smov (%p23_p0, %s22_s19), 0  ;;  %s745_s20 = smov (!%p23_p0, %s25_s20), %s609_s17 }
   0x8   : > { %p43_p3 = por %p42_p2, %p41_p1  ;;  %p27_p4 = scmp.ge.s32.totalorder %s745_s20, 2 }
   0x9   : > { %s30_s21 = ssub.s32 %s605_s16, %s743_s19  ;;  %p445_p6 = scmp.ge.s32.totalorder %s613_s18, 4 }
   0xa   : > { %s747_s20 = smov (%p27_p4, %s745_s20), 0 }
   0xb   : > { %s29_s22 = ssub.s32 %s609_s17, %s747_s20  ;;  %143 = sbr.rel (%p445_p6) target bundleno = 31 (0x1f), region = 24 }
   0xc   : > { %s31_s23 = sor.u32 %s30_s21, %s29_s22 }
   0xd   : > { %p32_p5 = scmp.eq.s32.totalorder %s31_s23, 0 }
   0xf   : > { %s687_s25 = scalar_select %p32_p5, %s593_s13, %s34_s24  }
  0x10   : > { %146 = sbr.rel (!%p43_p3) target bundleno = 31 (0x1f), region = 28  ;;  %s148_s26 = sand.u32 (%p43_p3), 1, %s593_s13  }
  0x11   : > { %s447_s27 = sshll.u32 (%p43_p3), %s605_s16, 2  ;;  %s446_s28 = sshll.u32 (%p43_p3), %s148_s26, 6 }
  0x12   : > { %s448_s29 = sshll.u32 (%p43_p3), %s609_s17, 5  ;;  %s150_s8 = scalar_lea.vmem (%p43_p3), [#allocation2], %s446_s28 }
  0x13   : > { %s153_s30 = sadd.s32 (%p43_p3), %s448_s29, %s447_s27 }
  0x14   : > { %s449_s4 = sshll.u32 (%p43_p3), %s153_s30, 2 }
  0x15   : > { %s155_s7 = scalar_lea.vmem %s732_s0, %s449_s4 }
  0x16   : > { %v168_v0 = vld [vmem:[%s155_s7] sm:$0xff]  ;;  %v170_v1 = vld [vmem:[%s155_s7 + $0x8] sm:$0xff] }
  0x17   : > { %v172_v2 = vld [vmem:[%s155_s7 + $0x20] sm:$0xff]  ;;  %169 = vst [vmem:[%s150_s8] sm:$0xff] %v168_v0  ;;  %v174_v3 = vld [vmem:[%s155_s7 + $0x28] sm:$0xff] }
  0x18   : > { %171 = vst [vmem:[%s150_s8 + $0x8] sm:$0xff] %v170_v1  ;;  %v176_v4 = vld [vmem:[%s155_s7 + $0x40] sm:$0xff]  ;;  %v178_v5 = vld [vmem:[%s155_s7 + $0x48] sm:$0xff] }
  0x19   : > { %173 = vst [vmem:[%s150_s8 + $0x10] sm:$0xff] %v172_v2  ;;  %v180_v6 = vld [vmem:[%s155_s7 + $0x60] sm:$0xff]  ;;  %v182_v7 = vld [vmem:[%s155_s7 + $0x68] sm:$0xff] }
  0x1a   : > { %175 = vst [vmem:[%s150_s8 + $0x18] sm:$0xff] %v174_v3 }
  0x1b   : > { %177 = vst [vmem:[%s150_s8 + $0x20] sm:$0xff] %v176_v4 }
  0x1c   : > { %179 = vst [vmem:[%s150_s8 + $0x28] sm:$0xff] %v178_v5 }
  0x1d   : > { %181 = vst [vmem:[%s150_s8 + $0x30] sm:$0xff] %v180_v6 }
  0x1e   : > { %183 = vst [vmem:[%s150_s8 + $0x38] sm:$0xff] %v182_v7 }
  0x1f PF: > { %p450_p7 = scmp.ge.s32.totalorder %s613_s18, 1  ;;  %p188_p8 = scmp.lt.s32.totalorder %s613_s18, 5 }
  0x21   : > { %p189_p9 = pnand %p450_p7, %p188_p8 }
  0x22   : > { %s195_s9 = sand.u32 (!%p189_p9), 1, %s589_s12   ;;  %s452_s24 = sshll.u32 (!%p189_p9), %s597_s14, 2 }
  0x23   : > { %192 = sbr.rel (%p189_p9) target bundleno = 192 (0xc0), region = 51  ;;  %s451_s21 = sshll.u32 (!%p189_p9), %s195_s9, 6 }
  0x24   : > { %s197_s22 = scalar_lea.vmem (!%p189_p9), [#allocation2], %s451_s21  ;;  %p224_p10 = scmp.lt.s32.totalorder (!%p189_p9), %s601_s15, 1 }
  0x25   : > { %p226_p11 = scmp.lt.s32.totalorder (!%p189_p9), %s452_s24, 7 }
  0x28   : > { %v243_v8 = vld [vmem:[%s734_s2] sm:$0xff]  ;;  %v615_v9 = vmov 0   ;;  %v499_v11 = vld [vmem:[%s197_s22 + $0x2c] sm:$0xf0]  ;;  %v475_v14 = vld [vmem:[%s197_s22 + $0x30] sm:$0xf0] }
  0x29   : > { %558 = vset.pattern.permute.xlu0 %v615_v9  ;;  %v473_v10 = vld [vmem:[%s197_s22 + $0x20] sm:$0xf]  ;;  %v497_v12 = vld [vmem:[%s197_s22 + $0x24] sm:$0xf]  ;;  %v481_v15 = vld [vmem:[%s197_s22 + $0x28] sm:$0xf] }
  0x2a   : > { %246 = vperm.xlu0 %558, %v243_v8   ;;  %v474_v13 = vor.u32 %v499_v11, %v473_v10  ;;  %v500_v16 = vld [vmem:[%s197_s22 + $0x34] sm:$0xf0]  ;;  %v478_v17 = vor.u32 %v497_v12, %v475_v14  ;;  %v498_v19 = vld [vmem:[%s197_s22 + $0x2c] sm:$0xf]  ;;  %v483_v20 = vld [vmem:[%s197_s22 + $0x38] sm:$0xf0] }
  0x2b   : > { %v482_v18 = vor.u32 %v500_v16, %v481_v15  ;;  %v457_v21 = vld [vmem:[%s197_s22] sm:$0xf]  ;;  %v486_v22 = vor.u32 %v498_v19, %v483_v20  ;;  %v495_v23 = vld [vmem:[%s197_s22 + $0xc] sm:$0xf0]  ;;  %v493_v24 = vld [vmem:[%s197_s22 + $0x4] sm:$0xf] }
  0x2c   : > { %299 = vmatpush.bf16.msra.mxu0 %v474_v13  ;;  %v459_v25 = vld [vmem:[%s197_s22 + $0x10] sm:$0xf0]  ;;  %312 = vmatpush.bf16.msra.mxu1 %v478_v17  ;;  %v458_v26 = vor.u32 %v495_v23, %v457_v21  ;;  %v465_v28 = vld [vmem:[%s197_s22 + $0x8] sm:$0xf]  ;;  %v496_v29 = vld [vmem:[%s197_s22 + $0x14] sm:$0xf0] }
  0x2d   : > { %325 = vmatpush.bf16.msra.mxu2 %v482_v18  ;;  %v462_v27 = vor.u32 %v493_v24, %v459_v25  ;;  %v494_v30 = vld [vmem:[%s197_s22 + $0xc] sm:$0xf]  ;;  %338 = vmatpush.bf16.msra.mxu3 %v486_v22  ;;  %v466_v31 = vor.u32 %v496_v29, %v465_v28  ;;  %v467_v32 = vld [vmem:[%s197_s22 + $0x18] sm:$0xf0]  ;;  %v234_v34 = vld [vmem:[%s733_s1] sm:$0xf] }
  0x2e   : > { %v470_v33 = vor.u32 %v494_v30, %v467_v32  ;;  %vm289_vm0 = vcmask 261120   ;;  %s749_s15 = smov (!%p224_p10, %s601_s15), 1  ;;  %s751_s24 = smov (!%p226_p11, %s452_s24), 7 }
  0x2f   : > { %s453_s26 = sshll.u32 %s749_s15, 3 }
  0x30   : > { %300 = vmatpush.bf16.msra.mxu0 %v458_v26  ;;  %313 = vmatpush.bf16.msra.mxu1 %v462_v27  ;;  %s229_s27 = sadd.s32 %s453_s26, %s751_s24 }
  0x31   : > { %326 = vmatpush.bf16.msra.mxu2 %v466_v31  ;;  %339 = vmatpush.bf16.msra.mxu3 %v470_v33  ;;  %s454_s28 = sshll.u32 %s229_s27, 3 }
  0x32   : > { %s231_s4 = scalar_lea.vmem %s735_s3, %s454_s28 }
  0x33   : > { %487 = vmatmul.msk.bf16.vlgmr.msra.gmra.mxu0 %vm289_vm0, %v234_v34  ;;  %488 = vmatmul.msk.bf16.vlgmr.msra.gmra.mxu1 %vm289_vm0, %v234_v34 }
  0x34   : > { %489 = vmatmul.msk.bf16.vlgmr.msra.gmra.mxu2 %vm289_vm0, %v234_v34  ;;  %490 = vmatmul.msk.bf16.vlgmr.msra.gmra.mxu3 %vm289_vm0, %v234_v34 }
  0x9c   : > { %v247_v35 = vpop.permute.xlu0 %246 }
  0xb0   : > { %v302_v36 = vpop.f32.mrf.mxu0  ;;  %v315_v37 = vpop.f32.mrf.mxu1 }
  0xb1   : > { %v303_v38 = vadd.f32 %v302_v36, %v247_v35  ;;  %v316_v39 = vadd.f32 %v315_v37, %v247_v35 }
  0xb3   : > { %345 = vst [vmem:[%s231_s4] sm:$0xff] %v303_v38 }
  0xb4   : > { %346 = vst [vmem:[%s231_s4 + $0x8] sm:$0xff] %v316_v39 }
  0xb7   : > { %v328_v40 = vpop.f32.mrf.mxu2  ;;  %v341_v42 = vpop.f32.mrf.mxu3 }
  0xb8   : > { %v329_v41 = vadd.f32 %v328_v40, %v247_v35  ;;  %v304_v43 = vpop.f32.mrf.mxu0  ;;  %v342_v44 = vadd.f32 %v341_v42, %v247_v35  ;;  %v317_v45 = vpop.f32.mrf.mxu1 }
  0xba   : > { %347 = vst [vmem:[%s231_s4 + $0x10] sm:$0xff] %v329_v41 }
  0xbb   : > { %348 = vst [vmem:[%s231_s4 + $0x18] sm:$0xff] %v342_v44 }
  0xbf   : > { %v330_v46 = vpop.f32.mrf.mxu2  ;;  %v343_v47 = vpop.f32.mrf.mxu3 }
  0xc0 PF: > { %s13_s18 = sadd.s32 1, %s613_s18   ;;  %s736_s12 = smov %s593_s13 }
  0xc1   : > { %p10_p12 = scmp.ge.s32.totalorder %s13_s18, 6   ;;  %s737_s13 = smov %s687_s25 }
  0xc2   : > { %s738_s14 = smov %s605_s16  ;;  %s739_s15 = smov %s609_s17 }
  0xc3   : > { %s740_s16 = smov %s743_s19  ;;  %s741_s17 = smov %s747_s20 }
  0xc4   :  { %12 = sbr.rel (!%p10_p12) target bundleno = 4 (0x4), region = 90 }

// kernel: esa_forward.7
= control target key start
LH: loop header
LB: loop body
LE: loop exit
PB: predicated region body
PF: predicated region fallthrough
CT: control target
= control target key end

     0   :  { %s593_s12 = smov 0   ;;  %s595_s13 = smov 0   ;;  %s690_s0 = inlined_call_operand.vmem [shape: bf16[2,72,256], index: 0, kind: input, shape index: {}]   ;;  %s691_s1 = inlined_call_operand.vmem [shape: bf16[8,72], index: 1, kind: input, shape index: {}]   ;;  %s692_s2 = inlined_call_operand.vmem [shape: f32[8,1], index: 2, kind: input, shape index: {}]   ;;  %s693_s3 = inlined_call_operand.vmem [shape: f32[2,8,256], index: 3, kind: output, shape index: {}]  }
   0x1   :  { %s597_s14 = smov 0   ;;  %s599_s15 = smov 0  }
   0x2   :  { %s601_s16 = smov 0   ;;  %s603_s17 = smov 0  }
   0x3   :  { %s605_s18 = smov 0  }
   0x4 LB: > { %s22_s19 = sadd.s32 1, %s562_s16  ;;  %s25_s20 = sadd.s32 1, %s566_s17  ;;  %s570_s18 = sphi %s605_s18, %s13_s18   ;;  %s566_s17 = sphi %s603_s17, %s699_s17   ;;  %s562_s16 = sphi %s601_s16, %s698_s16   ;;  %s558_s15 = sphi %s599_s15, %s697_s15   ;;  %s554_s14 = sphi %s597_s14, %s696_s14   ;;  %s550_s13 = sphi %s595_s13, %s695_s13   ;;  %s546_s12 = sphi %s593_s12, %s694_s12  }
   0x5   : > { %p23_p0 = scmp.ge.s32.totalorder %s22_s19, 2  ;;  %p41_p1 = scmp.ne.s32.totalorder %s550_s13, %s546_s12 }
   0x6   : > { %p42_p2 = scmp.eq.s32.totalorder %s570_s18, 0  ;;  %s34_s24 = sadd.s32 1, %s550_s13 }
   0x7   : > { %s701_s19 = smov (%p23_p0, %s22_s19), 0  ;;  %s703_s20 = smov (!%p23_p0, %s25_s20), %s566_s17 }
   0x8   : > { %p43_p3 = por %p42_p2, %p41_p1  ;;  %p27_p4 = scmp.ge.s32.totalorder %s703_s20, 2 }
   0x9   : > { %s30_s21 = ssub.s32 %s562_s16, %s701_s19  ;;  %p427_p6 = scmp.ge.s32.totalorder %s570_s18, 4 }
   0xa   : > { %s705_s20 = smov (%p27_p4, %s703_s20), 0 }
   0xb   : > { %s29_s22 = ssub.s32 %s566_s17, %s705_s20  ;;  %143 = sbr.rel (%p427_p6) target bundleno = 32 (0x20), region = 24 }
   0xc   : > { %s31_s23 = sor.u32 %s30_s21, %s29_s22 }
   0xd   : > { %p32_p5 = scmp.eq.s32.totalorder %s31_s23, 0 }
   0xf   : > { %s644_s25 = scalar_select %p32_p5, %s550_s13, %s34_s24  }
  0x10   : > { %146 = sbr.rel (!%p43_p3) target bundleno = 32 (0x20), region = 28  ;;  %s148_s26 = sand.u32 (%p43_p3), 1, %s550_s13  }
  0x11   : > { %s456_s27 = smul.u32 (%p43_p3), 18, %s566_s17 }
  0x12   : > { %s455_s28 = smul.u32 (%p43_p3), 36, %s148_s26 }
  0x13   : > { %s152_s29 = sadd.s32 (%p43_p3), %s562_s16, %s456_s27 }
  0x14   : > { %s428_s30 = sshll.u32 (%p43_p3), %s152_s29, 2  ;;  %s150_s7 = scalar_lea.vmem (%p43_p3), [#allocation2], %s455_s28 }
  0x15   : > { %s154_s6 = scalar_lea.vmem %s690_s0, %s428_s30 }
  0x16   : > { %v171_v0 = vld [vmem:[%s154_s6] sm:$0xf]  ;;  %v173_v1 = vld [vmem:[%s154_s6 + $0x8] sm:$0xf]  ;;  %v175_v2 = vld [vmem:[%s154_s6 + $0x10] sm:$0xf] }
  0x17   : > { %172 = vst [vmem:[%s150_s7] sm:$0xf] %v171_v0  ;;  %v177_v3 = vld [vmem:[%s154_s6 + $0x18] sm:$0xf]  ;;  %v179_v4 = vld [vmem:[%s154_s6 + $0x20] sm:$0xf] }
  0x18   : > { %174 = vst [vmem:[%s150_s7 + $0x4] sm:$0xf] %v173_v1  ;;  %v181_v5 = vld [vmem:[%s154_s6 + $0x28] sm:$0xf]  ;;  %v183_v6 = vld [vmem:[%s154_s6 + $0x30] sm:$0xf] }
  0x19   : > { %176 = vst [vmem:[%s150_s7 + $0x8] sm:$0xf] %v175_v2  ;;  %v185_v7 = vld [vmem:[%s154_s6 + $0x38] sm:$0xf]  ;;  %v187_v8 = vld [vmem:[%s154_s6 + $0x40] sm:$0xf] }
  0x1a   : > { %178 = vst [vmem:[%s150_s7 + $0xc] sm:$0xf] %v177_v3 }
  0x1b   : > { %180 = vst [vmem:[%s150_s7 + $0x10] sm:$0xf] %v179_v4 }
  0x1c   : > { %182 = vst [vmem:[%s150_s7 + $0x14] sm:$0xf] %v181_v5 }
  0x1d   : > { %184 = vst [vmem:[%s150_s7 + $0x18] sm:$0xf] %v183_v6 }
  0x1e   : > { %186 = vst [vmem:[%s150_s7 + $0x1c] sm:$0xf] %v185_v7 }
  0x1f   : > { %188 = vst [vmem:[%s150_s7 + $0x20] sm:$0xf] %v187_v8 }
  0x20 PF: > { %p429_p7 = scmp.ge.s32.totalorder %s570_s18, 1  ;;  %p229_p8 = scmp.lt.s32.totalorder %s570_s18, 5 }
  0x22   : > { %p230_p9 = pnand %p429_p7, %p229_p8 }
  0x23   : > { %s236_s8 = sand.u32 (!%p230_p9), 1, %s546_s12   ;;  %p262_p10 = scmp.lt.s32.totalorder (!%p230_p9), %s558_s15, 1 }
  0x24   : > { %233 = sbr.rel (%p230_p9) target bundleno = 201 (0xc9), region = 69  ;;  %p264_p11 = scmp.lt.s32.totalorder (!%p230_p9), %s554_s14, 1 }
  0x25   : > { %s457_s9 = smul.u32 (!%p230_p9), 36, %s236_s8 }
  0x27   : > { %s238_s21 = scalar_lea.vmem (!%p230_p9), [#allocation2], %s457_s9 }
  0x29   : > { %v572_v9 = vmov 0   ;;  %v281_v10 = vld [vmem:[%s692_s2] sm:$0xff]  ;;  %vm318_vm0 = vcmask 1043456   ;;  %v453_v16 = vld [vmem:[%s238_s21 + $0x10] sm:$0xff]  ;;  %v452_v17 = vld [vmem:[%s238_s21 + $0x8] sm:$0xff]  ;;  %vm314_vm1 = vcmask 588800  }
  0x2a   : > { %515 = vset.pattern.permute.xlu0 %v572_v9  ;;  %v280_v11 = vld [vmem:[%s238_s21 + $0x20] sm:$0xf]  ;;  %v454_v15 = vld [vmem:[%s238_s21 + $0x18] sm:$0xff]  ;;  %s707_s15 = smov (!%p262_p10, %s558_s15), 1  ;;  %s709_s14 = smov (!%p264_p11, %s554_s14), 1 }
  0x2b   : > { %284 = vperm.xlu0 %515, %v281_v10   ;;  %v304_v12 = vunpack.c.l.b16 %v280_v11  ;;  %v451_v18 = vld [vmem:[%s238_s21] sm:$0xff]  ;;  %s430_s23 = sshll.u32 %s707_s15, 1 }
  0x2c   : > { %v271_v19 = vld [vmem:[%s691_s1] sm:$0xf]  ;;  %s267_s24 = sadd.s32 %s430_s23, %s709_s14 }
  0x2d   : > { %v309_v13 = vpack.c.b16 %v304_v12, %v304_v12  ;;  %s431_s26 = sshll.u32 %s267_s24, 3 }
  0x2e   : > { %s269_s29 = scalar_lea.vmem %s693_s3, %s431_s26 }
  0x2f   : > { %v320_v14 = vsel %vm318_vm0, %v309_v13, 0 }
  0x30   : > { %325 = vmatpush.bf16.msra.mxu0 %v320_v14 }
  0x34   : > { %326 = vmatpush.bf16.msra.mxu0 %v454_v15 }
  0x38   : > { %327 = vmatpush.bf16.msra.mxu0 %v453_v16 }
  0x3c   : > { %328 = vmatpush.bf16.msra.mxu0 %v452_v17 }
  0x40   : > { %329 = vmatpush.bf16.msra.mxu0 %v451_v18 }
  0x43   : > { %448 = vmatmul.msk.bf16.vlgmr.msra.gmra.mxu0 %vm314_vm1, %v271_v19 }
  0x9d   : > { %v285_v20 = vpop.permute.xlu0 %284 }
  0xc0   : > { %v331_v21 = vpop.f32.mrf.mxu0 }
  0xc1   : > { %v332_v22 = vadd.f32 %v331_v21, %v285_v20 }
  0xc3   : > { %335 = vst [vmem:[%s269_s29] sm:$0xff] %v332_v22 }
  0xc8   : > { %v333_v23 = vpop.f32.mrf.mxu0 }
  0xc9 PF: > { %s13_s18 = sadd.s32 1, %s570_s18   ;;  %s694_s12 = smov %s550_s13 }
  0xca   : > { %p10_p12 = scmp.ge.s32.totalorder %s13_s18, 6   ;;  %s695_s13 = smov %s644_s25 }
  0xcb   : > { %s696_s14 = smov %s562_s16  ;;  %s697_s15 = smov %s566_s17 }
  0xcc   : > { %s698_s16 = smov %s701_s19  ;;  %s699_s17 = smov %s705_s20 }
  0xcd   :  { %12 = sbr.rel (!%p10_p12) target bundleno = 4 (0x4), region = 108 }

// kernel: esa_forward.8
= control target key start
LH: loop header
LB: loop body
LE: loop exit
PB: predicated region body
PF: predicated region fallthrough
CT: control target
= control target key end

     0   :  { %s446_s12 = smov 0   ;;  %s448_s13 = smov 0   ;;  %s485_s0 = inlined_call_operand.vmem [shape: bf16[2,72,128], index: 0, kind: input, shape index: {}]   ;;  %s486_s1 = inlined_call_operand.vmem [shape: bf16[8,72], index: 1, kind: input, shape index: {}]   ;;  %s487_s2 = inlined_call_operand.vmem [shape: f32[8,1], index: 2, kind: input, shape index: {}]   ;;  %s488_s3 = inlined_call_operand.vmem [shape: f32[2,8,128], index: 3, kind: output, shape index: {}]  }
   0x1   :  { %s450_s14 = smov 0  }
   0x2 LB: > { %s25_s15 = sadd.s32 1, %s419_s13  ;;  %p348_p0 = scmp.ge.s32.totalorder %s423_s14, 1  ;;  %s423_s14 = sphi %s450_s14, %s13_s14   ;;  %s419_s13 = sphi %s448_s13, %s490_s13   ;;  %s415_s12 = sphi %s446_s12, %s489_s12  }
   0x3   : > { %p27_p1 = scmp.ge.s32.totalorder %s25_s15, 2  ;;  %p156_p2 = scmp.lt.s32.totalorder %s423_s14, 3 }
   0x5   : > { %s492_s15 = smov (%p27_p1, %s25_s15), 0  ;;  %p157_p3 = pnand %p348_p0, %p156_p2 }
   0x6   : > { %p185_p4 = scmp.lt.s32.totalorder (!%p157_p3), %s415_s12, 1 }
   0x7   : > { %160 = sbr.rel (%p157_p3) target bundleno = 175 (0xaf), region = 32 }
   0xc   : > { %v425_v0 = vmov 0   ;;  %v211_v1 = vld [vmem:[%s487_s2] sm:$0xff]  ;;  %s494_s12 = smov (!%p185_p4, %s415_s12), 1  ;;  %vm248_vm0 = vcmask 1043456   ;;  %vm244_vm1 = vcmask 588800  }
   0xd   : > { %400 = vset.pattern.permute.xlu0 %v425_v0  ;;  %s374_s18 = smul.u32 36, %s494_s12  ;;  %v201_v10 = vld [vmem:[%s486_s1] sm:$0xf]  ;;  %s350_s24 = sshll.u32 %s494_s12, 3 }
   0xe   : > { %214 = vperm.xlu0 %400, %v211_v1   ;;  %s199_s27 = scalar_lea.vmem %s488_s3, %s350_s24 }
   0xf   : > { %s192_s21 = scalar_lea.vmem %s485_s0, %s374_s18 }
  0x10   : > { %v210_v2 = vld [vmem:[%s192_s21 + $0x20] sm:$0xf]  ;;  %v373_v6 = vld [vmem:[%s192_s21 + $0x18] sm:$0xff]  ;;  %v372_v7 = vld [vmem:[%s192_s21 + $0x10] sm:$0xff] }
  0x11   : > { %v234_v3 = vunpack.c.l.b16 %v210_v2  ;;  %v371_v8 = vld [vmem:[%s192_s21 + $0x8] sm:$0xff]  ;;  %v370_v9 = vld [vmem:[%s192_s21] sm:$0xff] }
  0x13   : > { %v239_v4 = vpack.c.b16 %v234_v3, %v234_v3 }
  0x15   : > { %v250_v5 = vsel %vm248_vm0, %v239_v4, 0 }
  0x16   : > { %255 = vmatpush.bf16.msra.mxu0 %v250_v5 }
  0x1a   : > { %256 = vmatpush.bf16.msra.mxu0 %v373_v6 }
  0x1e   : > { %257 = vmatpush.bf16.msra.mxu0 %v372_v7 }
  0x22   : > { %258 = vmatpush.bf16.msra.mxu0 %v371_v8 }
  0x26   : > { %259 = vmatpush.bf16.msra.mxu0 %v370_v9 }
  0x29   : > { %367 = vmatmul.msk.bf16.vlgmr.msra.gmra.mxu0 %vm244_vm1, %v201_v10 }
  0x80   : > { %v215_v11 = vpop.permute.xlu0 %214 }
  0xa6   : > { %v261_v12 = vpop.f32.mrf.mxu0 }
  0xa7   : > { %v262_v13 = vadd.f32 %v261_v12, %v215_v11 }
  0xa9   : > { %v265_v14 = vmax.f32 %v262_v13, 0.0 }
  0xab   : > { %266 = vst [vmem:[%s199_s27] sm:$0xff] %v265_v14 }
  0xae   : > { %v263_v15 = vpop.f32.mrf.mxu0 }
  0xaf PF: > { %s13_s14 = sadd.s32 1, %s423_s14   ;;  %s489_s12 = smov %s419_s13 }
  0xb0   : > { %p10_p5 = scmp.ge.s32.totalorder %s13_s14, 4   ;;  %s490_s13 = smov %s492_s15 }
  0xb2   :  { %12 = sbr.rel (!%p10_p5) target bundleno = 2 (0x2), region = 62 }

// kernel: esa_forward.10
= control target key start
LH: loop header
LB: loop body
LE: loop exit
PB: predicated region body
PF: predicated region fallthrough
CT: control target
= control target key end

     0   :  { %s445_s12 = smov 0   ;;  %s447_s13 = smov 0   ;;  %s484_s0 = inlined_call_operand.vmem [shape: bf16[2,72,128], index: 0, kind: input, shape index: {}]   ;;  %s485_s1 = inlined_call_operand.vmem [shape: bf16[8,72], index: 1, kind: input, shape index: {}]   ;;  %s486_s2 = inlined_call_operand.vmem [shape: f32[8,1], index: 2, kind: input, shape index: {}]   ;;  %s487_s3 = inlined_call_operand.vmem [shape: f32[2,8,128], index: 3, kind: output, shape index: {}]  }
   0x1   :  { %s449_s14 = smov 0  }
   0x2 LB: > { %s25_s15 = sadd.s32 1, %s418_s13  ;;  %p347_p0 = scmp.ge.s32.totalorder %s422_s14, 1  ;;  %s422_s14 = sphi %s449_s14, %s13_s14   ;;  %s418_s13 = sphi %s447_s13, %s489_s13   ;;  %s414_s12 = sphi %s445_s12, %s488_s12  }
   0x3   : > { %p27_p1 = scmp.ge.s32.totalorder %s25_s15, 2  ;;  %p156_p2 = scmp.lt.s32.totalorder %s422_s14, 3 }
   0x5   : > { %s491_s15 = smov (%p27_p1, %s25_s15), 0  ;;  %p157_p3 = pnand %p347_p0, %p156_p2 }
   0x6   : > { %p185_p4 = scmp.lt.s32.totalorder (!%p157_p3), %s414_s12, 1 }
   0x7   : > { %160 = sbr.rel (%p157_p3) target bundleno = 175 (0xaf), region = 32 }
   0xc   : > { %v424_v0 = vmov 0   ;;  %v211_v1 = vld [vmem:[%s486_s2] sm:$0xff]  ;;  %s493_s12 = smov (!%p185_p4, %s414_s12), 1  ;;  %vm248_vm0 = vcmask 1043456   ;;  %vm244_vm1 = vcmask 588800  }
   0xd   : > { %399 = vset.pattern.permute.xlu0 %v424_v0  ;;  %s373_s18 = smul.u32 36, %s493_s12  ;;  %v201_v10 = vld [vmem:[%s485_s1] sm:$0xf]  ;;  %s349_s24 = sshll.u32 %s493_s12, 3 }
   0xe   : > { %214 = vperm.xlu0 %399, %v211_v1   ;;  %s199_s27 = scalar_lea.vmem %s487_s3, %s349_s24 }
   0xf   : > { %s192_s21 = scalar_lea.vmem %s484_s0, %s373_s18 }
  0x10   : > { %v210_v2 = vld [vmem:[%s192_s21 + $0x20] sm:$0xf]  ;;  %v372_v6 = vld [vmem:[%s192_s21 + $0x18] sm:$0xff]  ;;  %v371_v7 = vld [vmem:[%s192_s21 + $0x10] sm:$0xff] }
  0x11   : > { %v234_v3 = vunpack.c.l.b16 %v210_v2  ;;  %v370_v8 = vld [vmem:[%s192_s21 + $0x8] sm:$0xff]  ;;  %v369_v9 = vld [vmem:[%s192_s21] sm:$0xff] }
  0x13   : > { %v239_v4 = vpack.c.b16 %v234_v3, %v234_v3 }
  0x15   : > { %v250_v5 = vsel %vm248_vm0, %v239_v4, 0 }
  0x16   : > { %255 = vmatpush.bf16.msra.mxu0 %v250_v5 }
  0x1a   : > { %256 = vmatpush.bf16.msra.mxu0 %v372_v6 }
  0x1e   : > { %257 = vmatpush.bf16.msra.mxu0 %v371_v7 }
  0x22   : > { %258 = vmatpush.bf16.msra.mxu0 %v370_v8 }
  0x26   : > { %259 = vmatpush.bf16.msra.mxu0 %v369_v9 }
  0x29   : > { %366 = vmatmul.msk.bf16.vlgmr.msra.gmra.mxu0 %vm244_vm1, %v201_v10 }
  0x80   : > { %v215_v11 = vpop.permute.xlu0 %214 }
  0xa6   : > { %v261_v12 = vpop.f32.mrf.mxu0 }
  0xa7   : > { %v262_v13 = vadd.f32 %v261_v12, %v215_v11 }
  0xa9   : > { %265 = vst [vmem:[%s199_s27] sm:$0xff] %v262_v13 }
  0xae   : > { %v263_v14 = vpop.f32.mrf.mxu0 }
  0xaf PF: > { %s13_s14 = sadd.s32 1, %s422_s14   ;;  %s488_s12 = smov %s418_s13 }
  0xb0   : > { %p10_p5 = scmp.ge.s32.totalorder %s13_s14, 4   ;;  %s489_s13 = smov %s491_s15 }
  0xb2   :  { %12 = sbr.rel (!%p10_p5) target bundleno = 2 (0x2), region = 62 }

// kernel: esa_forward.11
= control target key start
LH: loop header
LB: loop body
LE: loop exit
PB: predicated region body
PF: predicated region fallthrough
CT: control target
= control target key end

     0   :  { %s1455_s24 = smov 0   ;;  %s1457_s25 = smov 0   ;;  %s1916_s0 = inlined_call_operand.vmem [shape: f32[2,8,1024], index: 0, kind: input, shape index: {}]   ;;  %s1917_s1 = inlined_call_operand.vmem [shape: bf16[2,8,1024], index: 1, kind: input, shape index: {}]   ;;  %s1918_s2 = inlined_call_operand.vmem [shape: f32[2,32,1024], index: 2, kind: input, shape index: {}]   ;;  %s1919_s3 = inlined_call_operand.vmem [shape: bf16[8,8], index: 3, kind: input, shape index: {}]   ;;  %s1920_s4 = inlined_call_operand.vmem [shape: f32[8,1], index: 4, kind: input, shape index: {}]   ;;  %s1921_s5 = inlined_call_operand.vmem [shape: bf16[32,8], index: 5, kind: input, shape index: {}]   ;;  %s1922_s6 = inlined_call_operand.vmem [shape: f32[32,1], index: 6, kind: input, shape index: {}]   ;;  %s1923_s7 = inlined_call_operand.vmem [shape: f32[2,32,1024], index: 7, kind: output, shape index: {}]  }
   0x1   :  { %s1459_s26 = smov 0   ;;  %s1461_s27 = smov 0  }
   0x2   :  { %s1463_s28 = smov 0   ;;  %s1465_s29 = smov 0  }
   0x3   :  { %s1467_s30 = smov 0  }
   0x4 LB: > { %s26_s8 = sadd.s32 1, %s1404_s28  ;;  %s29_s9 = sadd.s32 1, %s1408_s29  ;;  %s1412_s30 = sphi %s1467_s30, %s17_s30   ;;  %s1408_s29 = sphi %s1465_s29, %s1954_s29   ;;  %s1404_s28 = sphi %s1463_s28, %s1953_s28   ;;  %s1400_s27 = sphi %s1461_s27, %s1952_s27   ;;  %s1396_s26 = sphi %s1459_s26, %s1951_s26   ;;  %s1392_s25 = sphi %s1457_s25, %s1950_s25   ;;  %s1388_s24 = sphi %s1455_s24, %s1949_s24  }
   0x5   : > { %p27_p0 = scmp.ge.s32.totalorder %s26_s8, 2  ;;  %s1173_s10 = sadd.s32 4294967295, %s1412_s30  }
   0x6   : > { %p101_p1 = scmp.ne.s32.totalorder %s1392_s25, %s1388_s24  ;;  %p102_p2 = scmp.eq.s32.totalorder %s1412_s30, 0 }
   0x7   : > { %s1956_s8 = smov (%p27_p0, %s26_s8), 0  ;;  %s1958_s9 = smov (!%p27_p0, %s29_s9), %s1408_s29 }
   0x8   : > { %p31_p3 = scmp.ge.s32.totalorder %s1958_s9, 2  ;;  %p217_p4 = scmp.eq.s32.totalorder %s1173_s10, 3 }
   0x9   : > { %s90_s11 = ssub.s32 %s1404_s28, %s1956_s8  ;;  %p103_p5 = por %p102_p2, %p101_p1 }
   0xa   : > { %s1960_s9 = smov (%p31_p3, %s1958_s9), 0  ;;  %p1503_p6 = por %p217_p4, %p101_p1 }
   0xb   : > { %s89_s13 = ssub.s32 %s1408_s29, %s1960_s9  ;;  %s94_s15 = sadd.s32 1, %s1392_s25 }
   0xc   : > { %s91_s14 = sor.u32 %s90_s11, %s89_s13  ;;  %p1176_p8 = scmp.ge.s32.totalorder %s1412_s30, 4 }
   0xd   : > { %p92_p7 = scmp.eq.s32.totalorder %s91_s14, 0 }
   0xe   : > { %251 = sbr.rel (%p1176_p8) target bundleno = 42 (0x2a), region = 32 }
   0xf   : > { %s1511_s16 = scalar_select %p92_p7, %s1392_s25, %s94_s15  }
  0x13   : > { %280 = sbr.rel (!%p103_p5) target bundleno = 42 (0x2a), region = 44  ;;  %s282_s17 = sand.u32 (%p103_p5), 1, %s1392_s25  }
  0x14   : > { %s1178_s18 = sshll.u32 (%p103_p5), %s1404_s28, 2  ;;  %s1177_s19 = sshll.u32 (%p103_p5), %s282_s17, 7 }
  0x15   : > { %s1179_s20 = sshll.u32 (%p103_p5), %s1408_s29, 5  ;;  %s284_s13 = scalar_lea.vmem (%p103_p5), [#allocation2], %s1177_s19 }
  0x16   : > { %s287_s21 = sadd.s32 (%p103_p5), %s1179_s20, %s1178_s18 }
  0x17   : > { %s1180_s22 = sshll.u32 (%p103_p5), %s287_s21, 3 }
  0x18   : > { %s1520_s11 = scalar_lea.vmem %s1918_s2, %s1180_s22 }
  0x19   : > { %v302_v0 = vld [vmem:[%s1520_s11] sm:$0xff]  ;;  %v304_v1 = vld [vmem:[%s1520_s11 + $0x8] sm:$0xff]  ;;  %v306_v2 = vld [vmem:[%s1520_s11 + $0x10] sm:$0xff] }
  0x1a   : > { %303 = vst [vmem:[%s284_s13] sm:$0xff] %v302_v0  ;;  %v308_v3 = vld [vmem:[%s1520_s11 + $0x18] sm:$0xff]  ;;  %v310_v4 = vld [vmem:[%s1520_s11 + $0x40] sm:$0xff]  ;;  %v312_v5 = vld [vmem:[%s1520_s11 + $0x48] sm:$0xff] }
  0x1b   : > { %305 = vst [vmem:[%s284_s13 + $0x8] sm:$0xff] %v304_v1  ;;  %v314_v6 = vld [vmem:[%s1520_s11 + $0x50] sm:$0xff]  ;;  %v316_v7 = vld [vmem:[%s1520_s11 + $0x58] sm:$0xff]  ;;  %v318_v8 = vld [vmem:[%s1520_s11 + $0x80] sm:$0xff] }
  0x1c   : > { %307 = vst [vmem:[%s284_s13 + $0x10] sm:$0xff] %v306_v2  ;;  %v320_v9 = vld [vmem:[%s1520_s11 + $0x88] sm:$0xff]  ;;  %v322_v10 = vld [vmem:[%s1520_s11 + $0x90] sm:$0xff]  ;;  %v324_v11 = vld [vmem:[%s1520_s11 + $0x98] sm:$0xff] }
  0x1d   : > { %309 = vst [vmem:[%s284_s13 + $0x18] sm:$0xff] %v308_v3  ;;  %v326_v12 = vld [vmem:[%s1520_s11 + $0xc0] sm:$0xff]  ;;  %v328_v13 = vld [vmem:[%s1520_s11 + $0xc8] sm:$0xff]  ;;  %v330_v14 = vld [vmem:[%s1520_s11 + $0xd0] sm:$0xff] }
  0x1e   : > { %311 = vst [vmem:[%s284_s13 + $0x20] sm:$0xff] %v310_v4  ;;  %v332_v15 = vld [vmem:[%s1520_s11 + $0xd8] sm:$0xff] }
  0x1f   : > { %313 = vst [vmem:[%s284_s13 + $0x28] sm:$0xff] %v312_v5 }
  0x20   : > { %315 = vst [vmem:[%s284_s13 + $0x30] sm:$0xff] %v314_v6 }
  0x21   : > { %317 = vst [vmem:[%s284_s13 + $0x38] sm:$0xff] %v316_v7 }
  0x22   : > { %319 = vst [vmem:[%s284_s13 + $0x40] sm:$0xff] %v318_v8 }
  0x23   : > { %321 = vst [vmem:[%s284_s13 + $0x48] sm:$0xff] %v320_v9 }
  0x24   : > { %323 = vst [vmem:[%s284_s13 + $0x50] sm:$0xff] %v322_v10 }
  0x25   : > { %325 = vst [vmem:[%s284_s13 + $0x58] sm:$0xff] %v324_v11 }
  0x26   : > { %327 = vst [vmem:[%s284_s13 + $0x60] sm:$0xff] %v326_v12 }
  0x27   : > { %329 = vst [vmem:[%s284_s13 + $0x68] sm:$0xff] %v328_v13 }
  0x28   : > { %331 = vst [vmem:[%s284_s13 + $0x70] sm:$0xff] %v330_v14 }
  0x29   : > { %333 = vst [vmem:[%s284_s13 + $0x78] sm:$0xff] %v332_v15 }
  0x2a PF: > { %p1181_p9 = scmp.ge.s32.totalorder %s1412_s30, 1  ;;  %p338_p10 = scmp.lt.s32.totalorder %s1412_s30, 5 }
  0x2c   : > { %p339_p11 = pnand %p1181_p9, %p338_p10 }
  0x2d   : > { %s1541_s14 = sshll.u32 (!%p339_p11), %s1396_s26, 2  ;;  %p394_p12 = scmp.lt.s32.totalorder (!%p339_p11), %s1400_s27, 1 }
  0x2e   : > { %342 = sbr.rel (%p339_p11) target bundleno = 431 (0x1af), region = 67  ;;  %p396_p13 = scmp.lt.s32.totalorder (!%p339_p11), %s1541_s14, 7 }
  0x33   : > { %v506_v16 = vld [vmem:[%s1920_s4] sm:$0xff]  ;;  %s395_s18 = scalar_select %p394_p12, %s1400_s27, 1  ;;  %v1414_v17 = vmov 0   ;;  %vm433_vm0 = vcmask 1043456   ;;  %vm429_vm1 = vcmask 64512   ;;  %v525_v36 = vld [vmem:[%s1922_s6 + $0x8] sm:$0xff] }
  0x34   : > { %1291 = vset.pattern.permute.xlu0 %v1414_v17  ;;  %1292 = vset.pattern.permute.xlu1 %v1414_v17  ;;  %s397_s19 = scalar_select %p396_p13, %s1541_s14, 7  ;;  %v524_v20 = vld [vmem:[%s1922_s6] sm:$0xff]  ;;  %v527_v42 = vld [vmem:[%s1922_s6 + $0x18] sm:$0xff]  ;;  %v526_v45 = vld [vmem:[%s1922_s6 + $0x10] sm:$0xff] }
  0x35   : > { %509 = vperm.xlu0 %1291, %v506_v16   ;;  %1293 = vset.pattern.permute.xlu2 %v1414_v17  ;;  %s1185_s20 = sshll.u32 %s395_s18, 3  ;;  %v416_v33 = vld [vmem:[%s1919_s3] sm:$0xf]  ;;  %v1233_v3 = vld [vmem:[%s1921_s5 + $0x8] sm:$0xff]  ;;  %s1228_s23 = sshll.u32 (%p1503_p6), %s1400_s27, 5 }
  0x36   : > { %s1550_s21 = sadd.s32 %s1185_s20, %s397_s19  ;;  %535 = vperm.xlu1 %1292, %v525_v36   ;;  %545 = vperm.xlu2 %1293, %v527_v42   ;;  %v1232_v54 = vld [vmem:[%s1921_s5] sm:$0xff]  ;;  %s345_s20 = sand.u32 1, %s1388_s24  }
  0x37   : > { %s1189_s26 = sshll.u32 %s1550_s21, 2  ;;  %s1186_s18 = sshll.u32 %s1550_s21, 3 }
  0x38   : > { %s411_s10 = scalar_lea.vmem %s1917_s1, %s1189_s26  ;;  %s401_s26 = scalar_lea.vmem %s1916_s0, %s1186_s18 }
  0x39   : > { %v417_v18 = vld [vmem:[%s411_s10] sm:$0xff]  ;;  %v418_v19 = vld [vmem:[%s411_s10 + $0x8] sm:$0xff]  ;;  %v500_v46 = vld [vmem:[%s401_s26 + $0x10] sm:$0xff]  ;;  %s1623_s24 = sshll.u32 %s345_s20, 7  ;;  %s1013_s10 = sadd.s32 (%p1503_p6), %s1228_s23, %s1541_s14 }
  0x3a   : > { %v421_v21 = vunpack.c.l.b16 %v417_v18  ;;  %v422_v22 = vunpack.c.h.b16 %v417_v18  ;;  %v423_v23 = vunpack.c.l.b16 %v418_v19  ;;  %v424_v24 = vunpack.c.h.b16 %v418_v19  ;;  %v498_v34 = vld [vmem:[%s401_s26] sm:$0xff]  ;;  %v499_v35 = vld [vmem:[%s401_s26 + $0x8] sm:$0xff]  ;;  %v501_v47 = vld [vmem:[%s401_s26 + $0x18] sm:$0xff]  ;;  %s1646_s26 = scalar_lea.vmem [#allocation2], %s1623_s24  ;;  %s1675_s22 = scalar_lea.vmem [#allocation3], %s1623_s24 }
  0x3b   : > { %s1229_s11 = sshll.u32 (%p1503_p6), %s1013_s10, 3 }
  0x3c   : > { %v425_v25 = vpack.c.b16 %v421_v21, %v421_v21  ;;  %v426_v26 = vpack.c.b16 %v422_v22, %v422_v22  ;;  %v427_v27 = vpack.c.b16 %v423_v23, %v423_v23  ;;  %v428_v28 = vpack.c.b16 %v424_v24, %v424_v24  ;;  %s1015_s12 = scalar_lea.vmem (%p1503_p6), %s1923_s7, %s1229_s11 }
  0x3d   : > { %530 = vperm.xlu0 %1291, %v524_v20  }
  0x3e   : > { %v435_v29 = vsel %vm433_vm0, %v425_v25, 0  ;;  %v438_v30 = vsel %vm433_vm0, %v426_v26, 0  ;;  %v441_v31 = vsel %vm433_vm0, %v427_v27, 0  ;;  %v444_v32 = vsel %vm433_vm0, %v428_v28, 0  ;;  %540 = vperm.xlu1 %1292, %v526_v45  }
  0x3f   : > { %453 = vmatpush.bf16.msra.mxu0 %v435_v29  ;;  %466 = vmatpush.bf16.msra.mxu1 %v438_v30 }
  0x40   : > { %479 = vmatpush.bf16.msra.mxu2 %v441_v31  ;;  %492 = vmatpush.bf16.msra.mxu3 %v444_v32 }
  0x42   : > { %1190 = vmatmul.msk.bf16.vlgmr.msra.gmra.mxu0 %vm429_vm1, %v416_v33  ;;  %1191 = vmatmul.msk.bf16.vlgmr.msra.gmra.mxu1 %vm429_vm1, %v416_v33 }
  0x43   : > { %1192 = vmatmul.msk.bf16.vlgmr.msra.gmra.mxu2 %vm429_vm1, %v416_v33  ;;  %1193 = vmatmul.msk.bf16.vlgmr.msra.gmra.mxu3 %vm429_vm1, %v416_v33 }
  0xa7   : > { %v510_v41 = vpop.permute.xlu0 %509 }
  0xa8   : > { %v1601_v11 = vpop.permute.xlu1 %535 }
  0xaf   : > { %v531_v4 = vpop.permute.xlu0 %530 }
  0xb0   : > { %v1611_v24 = vpop.permute.xlu1 %540 }
  0xbf   : > { %v455_v37 = vpop.f32.mrf.mxu0  ;;  %v468_v38 = vpop.f32.mrf.mxu1 }
  0xc0   : > { %v502_v39 = vadd.f32 %v498_v34, %v455_v37  ;;  %v503_v40 = vadd.f32 %v499_v35, %v468_v38 }
  0xc2   : > { %v512_v43 = vadd.f32 %v510_v41, %v502_v39  ;;  %v513_v44 = vadd.f32 %v510_v41, %v503_v40 }
  0xc4   : > { %v520_v48 = vpack.c.bf16 %v512_v43, %v512_v43  ;;  %v521_v49 = vpack.c.bf16 %v513_v44, %v513_v44 }
  0xc6   : > { %v481_v50 = vpop.f32.mrf.mxu2  ;;  %v494_v51 = vpop.f32.mrf.mxu3  ;;  %v565_v52 = vsel %vm433_vm0, %v520_v48, 0  ;;  %v568_v53 = vsel %vm433_vm0, %v521_v49, 0 }
  0xc7   : > { %v504_v55 = vadd.f32 %v500_v46, %v481_v50  ;;  %v505_v56 = vadd.f32 %v501_v47, %v494_v51  ;;  %583 = vmatpush.bf16.msrb.mxu0 %v565_v52  ;;  %602 = vmatpush.bf16.msrb.mxu1 %v568_v53  ;;  %v457_v57 = vpop.f32.mrf.mxu0  ;;  %v470_v58 = vpop.f32.mrf.mxu1 }
  0xc9   : > { %v514_v59 = vadd.f32 %v510_v41, %v504_v55  ;;  %v515_v60 = vadd.f32 %v510_v41, %v505_v56 }
  0xca   : > { %1202 = vmatmul.msk.bf16.vlgmr.msrb.gmra.mxu0 %vm429_vm1, %v1232_v54  ;;  %1204 = vmatmul.msk.bf16.vlgmr.msrb.gmra.mxu1 %vm429_vm1, %v1232_v54 }
  0xcb   : > { %v522_v61 = vpack.c.bf16 %v514_v59, %v514_v59  ;;  %v523_v62 = vpack.c.bf16 %v515_v60, %v515_v60 }
  0xcd   : > { %v571_v63 = vsel %vm433_vm0, %v522_v61, 0  ;;  %v574_v0 = vsel %vm433_vm0, %v523_v62, 0 }
  0xce   : > { %v483_v1 = vpop.f32.mrf.mxu2  ;;  %v496_v2 = vpop.f32.mrf.mxu3  ;;  %621 = vmatpush.bf16.msrb.mxu2 %v571_v63  ;;  %640 = vmatpush.bf16.msrb.mxu3 %v574_v0 }
  0xcf   : > { %v652_v1 = vld [vmem:[%s1646_s26] sm:$0xff] }
  0xd1   : > { %1206 = vmatmul.msk.bf16.vlgmr.msrb.gmra.mxu2 %vm429_vm1, %v1232_v54  ;;  %1208 = vmatmul.msk.bf16.vlgmr.msrb.gmra.mxu3 %vm429_vm1, %v1232_v54 }
  0xda   : > { %1203 = vmatmul.msk.bf16.gmra.mxu0 %vm429_vm1, %v1233_v3  ;;  %1205 = vmatmul.msk.bf16.gmra.mxu1 %vm429_vm1, %v1233_v3 }
  0xe1   : > { %1207 = vmatmul.msk.bf16.gmra.mxu2 %vm429_vm1, %v1233_v3  ;;  %1209 = vmatmul.msk.bf16.gmra.mxu3 %vm429_vm1, %v1233_v3 }
 0x147   : > { %v585_v5 = vpop.f32.mrf.mxu0  ;;  %v604_v6 = vpop.f32.mrf.mxu1 }
 0x148   : > { %v586_v7 = vadd.f32 %v585_v5, %v531_v4  ;;  %v605_v8 = vadd.f32 %v604_v6, %v531_v4  ;;  %v653_v6 = vld [vmem:[%s1646_s26 + $0x8] sm:$0xff] }
 0x14a   : > { %v1210_v9 = vmul.f32 -1.442695, %v586_v7  ;;  %v1211_v10 = vmul.f32 -1.442695, %v605_v8 }
 0x14c   : > { %1294 = vpow2.f32 %v1210_v9 }
 0x14d   : > { %1296 = vpow2.f32 %v1211_v10 }
 0x14f   : > { %v587_v12 = vpop.f32.mrf.mxu0  ;;  %v606_v13 = vpop.f32.mrf.mxu1 }
 0x150   : > { %v588_v14 = vadd.f32 %v587_v12, %v1601_v11  ;;  %v607_v15 = vadd.f32 %v606_v13, %v1601_v11 }
 0x152   : > { %v1295_v16 = vpop.eup %1294  ;;  %v1214_v17 = vmul.f32 -1.442695, %v588_v14  ;;  %v1215_v20 = vmul.f32 -1.442695, %v607_v15 }
 0x153   : > { %v1297_v18 = vpop.eup %1296  ;;  %v1605_v19 = vadd.f32 1.0, %v1295_v16 }
 0x154   : > { %v1607_v21 = vadd.f32 1.0, %v1297_v18  ;;  %1298 = vpow2.f32 %v1214_v17  ;;  %v623_v22 = vpop.f32.mrf.mxu2  ;;  %v642_v23 = vpop.f32.mrf.mxu3 }
 0x155   : > { %1300 = vrcp.f32 %v1605_v19  ;;  %v624_v25 = vadd.f32 %v623_v22, %v531_v4  ;;  %v643_v27 = vadd.f32 %v642_v23, %v531_v4  ;;  %v741_v31 = vand.u32 2147483647, %v1605_v19 }
 0x156   : > { %1302 = vrcp.f32 %v1607_v21  ;;  %v743_v32 = vand.u32 2147483648, %v1605_v19  ;;  %v756_v35 = vand.u32 2147483647, %v1607_v21  ;;  %v758_v36 = vand.u32 2147483648, %v1607_v21 }
 0x157   : > { %1304 = vpow2.f32 %v1215_v20  ;;  %v590_v26 = vpop.f32.mrf.mxu0  ;;  %v1212_v28 = vmul.f32 -1.442695, %v624_v25  ;;  %v1213_v33 = vmul.f32 -1.442695, %v643_v27  ;;  %v609_v38 = vpop.f32.mrf.mxu1  ;;  %vm737_vm2 = vweird.f32 %v1605_v19 }
 0x158   : > { %v591_v29 = vadd.f32 %v590_v26, %v1611_v24  ;;  %vm752_vm3 = vweird.f32 %v1607_v21  ;;  %vm1628_vm4 = vcmp.eq.f32.partialorder %v741_v31, 8.507059e+37  ;;  %v610_v48 = vadd.f32 %v609_v38, %v1611_v24 }
 0x159   : > { %1306 = vpow2.f32 %v1212_v28  ;;  %v744_v49 = vor.u32 1.1754944e-38, %v743_v32  ;;  %vm1635_vm5 = vcmp.eq.f32.partialorder %v756_v35, 8.507059e+37  ;;  %v759_v52 = vor.u32 1.1754944e-38, %v758_v36  ;;  %v1693_v36 = vpop.permute.xlu2 %545 }
 0x15a   : > { %v1299_v30 = vpop.eup %1298  ;;  %1308 = vpow2.f32 %v1213_v33  ;;  %v1218_v43 = vmul.f32 -1.442695, %v591_v29  ;;  %v1219_v63 = vmul.f32 -1.442695, %v610_v48  ;;  %v656_v33 = vld [vmem:[%s1646_s26 + $0x20] sm:$0xff] }
 0x15b   : > { %v1301_v34 = vpop.eup %1300  ;;  %v1619_v37 = vadd.f32 1.0, %v1299_v30 }
 0x15c   : > { %v1303_v39 = vpop.eup %1302  ;;  %v733_v40 = vmul.f32 %v1301_v34, %v1605_v19  ;;  %v625_v47 = vpop.f32.mrf.mxu2  ;;  %vm738_vm6 = vweird.f32 %v1301_v34 }
 0x15d   : > { %v1305_v41 = vpop.eup %1304  ;;  %v748_v42 = vmul.f32 %v1303_v39, %v1607_v21  ;;  %1310 = vrcp.f32 %v1619_v37  ;;  %v644_v53 = vpop.f32.mrf.mxu3  ;;  %v801_v55 = vand.u32 2147483647, %v1619_v37  ;;  %vm753_vm7 = vweird.f32 %v1303_v39  ;;  %vm739_vm8 = vmor %vm737_vm2, %vm738_vm6 }
 0x15e   : > { %v734_v44 = vsub.f32 1.0, %v733_v40  ;;  %v1632_v46 = vadd.f32 1.0, %v1305_v41  ;;  %v626_v58 = vadd.f32 %v625_v47, %v1601_v11  ;;  %v645_v62 = vadd.f32 %v644_v53, %v1601_v11  ;;  %vm754_vm10 = vmor %vm752_vm3, %vm753_vm7  ;;  %v657_v47 = vld [vmem:[%s1646_s26 + $0x28] sm:$0xff] }
 0x15f   : > { %v749_v50 = vsub.f32 1.0, %v748_v42  ;;  %v1307_v56 = vpop.eup %1306  ;;  %vm797_vm9 = vweird.f32 %v1619_v37  ;;  %v803_v3 = vand.u32 2147483648, %v1619_v37  ;;  %vm1660_vm11 = vcmp.eq.f32.partialorder %v801_v55, 8.507059e+37  ;;  %v592_v38 = vpop.f32.mrf.mxu0 }
 0x160   : > { %v735_v54 = vmul.f32 %v1301_v34, %v734_v44  ;;  %1312 = vrcp.f32 %v1632_v46  ;;  %v1309_v59 = vpop.eup %1308  ;;  %v1642_v61 = vadd.f32 1.0, %v1307_v56  ;;  %v816_v4 = vand.u32 2147483647, %v1632_v46 }
 0x161   : > { %v750_v57 = vmul.f32 %v1303_v39, %v749_v50  ;;  %1314 = vpow2.f32 %v1218_v43  ;;  %v1665_v9 = vadd.f32 1.0, %v1309_v59  ;;  %v818_v12 = vand.u32 2147483648, %v1632_v46 }
 0x162   : > { %v736_v60 = vadd.f32 %v1301_v34, %v735_v54  ;;  %1316 = vrcp.f32 %v1642_v61  ;;  %v1216_v13 = vmul.f32 -1.442695, %v626_v58  ;;  %v1217_v18 = vmul.f32 -1.442695, %v645_v62 }
 0x163   : > { %v1311_v0 = vpop.eup %1310  ;;  %v751_v2 = vadd.f32 %v1303_v39, %v750_v57  ;;  %v804_v21 = vor.u32 1.1754944e-38, %v803_v3  ;;  %vm812_vm12 = vweird.f32 %v1632_v46  ;;  %v771_v25 = vand.u32 2147483647, %v1642_v61 }
 0x164   : > { %v740_v5 = vsel %vm739_vm8, %v1301_v34, %v736_v60  ;;  %v793_v7 = vmul.f32 %v1311_v0, %v1619_v37  ;;  %vm798_vm13 = vweird.f32 %v1311_v0  ;;  %1318 = vrcp.f32 %v1665_v9 }
 0x165   : > { %v745_v10 = vsel %vm1628_vm4, %v744_v49, %v740_v5  ;;  %v755_v11 = vsel %vm754_vm10, %v1303_v39, %v751_v2  ;;  %vm1681_vm14 = vcmp.eq.f32.partialorder %v816_v4, 8.507059e+37  ;;  %v819_v28 = vor.u32 1.1754944e-38, %v818_v12  ;;  %vm799_vm15 = vmor %vm797_vm9, %vm798_vm13  ;;  %v628_v4 = vpop.f32.mrf.mxu2 }
 0x166   : > { %v1313_v14 = vpop.eup %1312  ;;  %v972_v15 = vmul.f32 %v745_v10, %v652_v1  ;;  %v760_v16 = vsel %vm1635_vm5, %v759_v52, %v755_v11  ;;  %v794_v17 = vsub.f32 1.0, %v793_v7  ;;  %1320 = vpow2.f32 %v1216_v13 }
 0x167   : > { %v1315_v19 = vpop.eup %1314  ;;  %v973_v20 = vmul.f32 %v760_v16, %v653_v6  ;;  %v808_v22 = vmul.f32 %v1313_v14, %v1632_v46  ;;  %v773_v31 = vand.u32 2147483648, %v1642_v61  ;;  %1322 = vpow2.f32 %v1217_v18 }
 0x168   : > { %988 = vst [vmem:[%s1675_s22] sm:$0xff] %v972_v15  ;;  %v795_v23 = vmul.f32 %v1311_v0, %v794_v17  ;;  %v1317_v29 = vpop.eup %1316  ;;  %v1686_v32 = vadd.f32 1.0, %v1315_v19  ;;  %vm813_vm0 = vweird.f32 %v1313_v14  ;;  %vm767_vm1 = vweird.f32 %v1642_v61  ;;  %v655_v15 = vld [vmem:[%s1646_s26 + $0x18] sm:$0xff]  ;;  %v611_v19 = vpop.f32.mrf.mxu1 }
 0x169   : > { %989 = vst [vmem:[%s1675_s22 + $0x8] sm:$0xff] %v973_v20  ;;  %v809_v26 = vsub.f32 1.0, %v808_v22  ;;  %v763_v35 = vmul.f32 %v1317_v29, %v1642_v61  ;;  %vm1695_vm2 = vcmp.eq.f32.partialorder %v771_v25, 8.507059e+37  ;;  %v786_v41 = vand.u32 2147483647, %v1665_v9  ;;  %vm814_vm3 = vmor %vm812_vm12, %vm813_vm0 }
 0x16a   : > { %v796_v30 = vadd.f32 %v1311_v0, %v795_v23  ;;  %1324 = vpow2.f32 %v1219_v63  ;;  %v1319_v44 = vpop.eup %1318  ;;  %v774_v48 = vor.u32 1.1754944e-38, %v773_v31  ;;  %vm782_vm4 = vweird.f32 %v1665_v9 }
 0x16b   : > { %v810_v34 = vmul.f32 %v1313_v14, %v809_v26  ;;  %v764_v43 = vsub.f32 1.0, %v763_v35  ;;  %1326 = vrcp.f32 %v1686_v32  ;;  %v593_v49 = vadd.f32 %v592_v38, %v1693_v36  ;;  %v647_v26 = vpop.f32.mrf.mxu3  ;;  %v664_v35 = vld [vmem:[%s1646_s26 + $0x60] sm:$0xff] }
 0x16c   : > { %v800_v39 = vsel %vm799_vm15, %v1311_v0, %v796_v30  ;;  %v1321_v50 = vpop.eup %1320  ;;  %vm768_vm5 = vweird.f32 %v1317_v29  ;;  %v778_v53 = vmul.f32 %v1319_v44, %v1665_v9  ;;  %vm1713_vm6 = vcmp.eq.f32.partialorder %v786_v41, 8.507059e+37  ;;  %v654_v0 = vld [vmem:[%s1646_s26 + $0x10] sm:$0xff] }
 0x16d   : > { %v805_v37 = vsel %vm1660_vm11, %v804_v21, %v800_v39  ;;  %v811_v42 = vadd.f32 %v1313_v14, %v810_v34  ;;  %v765_v52 = vmul.f32 %v1317_v29, %v764_v43  ;;  %v1323_v54 = vpop.eup %1322  ;;  %v788_v56 = vand.u32 2147483648, %v1665_v9  ;;  %vm769_vm7 = vmor %vm767_vm1, %vm768_vm5 }
 0x16e   : > { %v976_v45 = vmul.f32 %v805_v37, %v656_v33  ;;  %v1718_v57 = vadd.f32 1.0, %v1321_v50  ;;  %v779_v60 = vsub.f32 1.0, %v778_v53  ;;  %v1720_v62 = vadd.f32 1.0, %v1323_v54 }
 0x16f   : > { %v815_v51 = vsel %vm814_vm3, %v1313_v14, %v811_v42  ;;  %v766_v59 = vadd.f32 %v1317_v29, %v765_v52  ;;  %v861_v1 = vand.u32 2147483647, %v1686_v32  ;;  %v863_v2 = vand.u32 2147483648, %v1686_v32 }
 0x170   : > { %992 = vst [vmem:[%s1675_s22 + $0x20] sm:$0xff] %v976_v45  ;;  %v820_v55 = vsel %vm1681_vm14, %v819_v28, %v815_v51  ;;  %v1325_v63 = vpop.eup %1324  ;;  %1328 = vrcp.f32 %v1718_v57  ;;  %v1222_v3 = vmul.f32 -1.442695, %v593_v49  ;;  %v780_v7 = vmul.f32 %v1319_v44, %v779_v60  ;;  %v630_v49 = vpop.f32.mrf.mxu2  ;;  %v660_v51 = vld [vmem:[%s1646_s26 + $0x40] sm:$0xff] }
 0x171   : > { %v977_v58 = vmul.f32 %v820_v55, %v657_v47  ;;  %v1728_v5 = vpop.eup %1326  ;;  %v770_v6 = vsel %vm769_vm7, %v1317_v29, %v766_v59  ;;  %vm783_vm8 = vweird.f32 %v1319_v44  ;;  %1330 = vrcp.f32 %v1720_v62  ;;  %v658_v59 = vld [vmem:[%s1646_s26 + $0x30] sm:$0xff] }
 0x172   : > { %v775_v61 = vsel %vm1695_vm2, %v774_v48, %v770_v6  ;;  %v789_v8 = vor.u32 1.1754944e-38, %v788_v56  ;;  %v833_v10 = vand.u32 2147483648, %v1718_v57  ;;  %vm857_vm9 = vweird.f32 %v1686_v32  ;;  %vm784_vm10 = vmor %vm782_vm4, %vm783_vm8 }
 0x173   : > { %993 = vst [vmem:[%s1675_s22 + $0x28] sm:$0xff] %v977_v58  ;;  %v974_v11 = vmul.f32 %v775_v61, %v654_v0  ;;  %v781_v12 = vadd.f32 %v1319_v44, %v780_v7  ;;  %v831_v13 = vand.u32 2147483647, %v1718_v57  ;;  %v1737_v14 = vadd.f32 1.0, %v1325_v63  ;;  %v649_v61 = vpop.f32.mrf.mxu3 }
 0x174   : > { %v846_v16 = vand.u32 2147483647, %v1720_v62  ;;  %v853_v17 = vmul.f32 %v1728_v5, %v1686_v32  ;;  %vm1745_vm11 = vcmp.eq.f32.partialorder %v861_v1, 8.507059e+37  ;;  %1332 = vpow2.f32 %v1222_v3 }
 0x175   : > { %990 = vst [vmem:[%s1675_s22 + $0x10] sm:$0xff] %v974_v11  ;;  %v785_v20 = vsel %vm784_vm10, %v1319_v44, %v781_v12  ;;  %vm827_vm12 = vweird.f32 %v1718_v57  ;;  %v864_v21 = vor.u32 1.1754944e-38, %v863_v2  ;;  %1334 = vrcp.f32 %v1737_v14  ;;  %v659_v2 = vld [vmem:[%s1646_s26 + $0x38] sm:$0xff] }
 0x176   : > { %v1329_v9 = vpop.eup %1328  ;;  %v790_v22 = vsel %vm1713_vm6, %v789_v8, %v785_v20  ;;  %v834_v23 = vor.u32 1.1754944e-38, %v833_v10  ;;  %vm842_vm13 = vweird.f32 %v1720_v62  ;;  %v854_v25 = vsub.f32 1.0, %v853_v17 }
 0x177   : > { %vm858_vm14 = vweird.f32 %v1728_v5  ;;  %v1331_v27 = vpop.eup %1330  ;;  %v975_v28 = vmul.f32 %v790_v22, %v655_v15  ;;  %v823_v29 = vmul.f32 %v1329_v9, %v1718_v57  ;;  %vm1757_vm15 = vcmp.eq.f32.partialorder %v831_v13, 8.507059e+37 }
 0x178   : > { %v848_v31 = vand.u32 2147483648, %v1720_v62  ;;  %v612_v33 = vadd.f32 %v611_v19, %v1693_v36  ;;  %v838_v34 = vmul.f32 %v1331_v27, %v1720_v62  ;;  %vm1764_vm0 = vcmp.eq.f32.partialorder %v846_v16, 8.507059e+37  ;;  %vm1776_vm2 = vmor %vm857_vm9, %vm858_vm14  ;;  %v661_v19 = vld [vmem:[%s1646_s26 + $0x48] sm:$0xff] }
 0x179   : > { %v855_v38 = vmul.f32 %v1728_v5, %v854_v25  ;;  %vm872_vm1 = vweird.f32 %v1737_v14  ;;  %v876_v39 = vand.u32 2147483647, %v1737_v14  ;;  %991 = vst [vmem:[%s1675_s22 + $0x18] sm:$0xff] %v975_v28  ;;  %v824_v40 = vsub.f32 1.0, %v823_v29 }
 0x17a   : > { %v878_v37 = vand.u32 2147483648, %v1737_v14  ;;  %v1223_v42 = vmul.f32 -1.442695, %v612_v33  ;;  %v629_v43 = vadd.f32 %v628_v4, %v1611_v24  ;;  %v1333_v44 = vpop.eup %1332  ;;  %vm828_vm3 = vweird.f32 %v1329_v9 }
 0x17b   : > { %v839_v45 = vsub.f32 1.0, %v838_v34  ;;  %v856_v47 = vadd.f32 %v1728_v5, %v855_v38  ;;  %v648_v48 = vadd.f32 %v647_v26, %v1611_v24  ;;  %v1335_v50 = vpop.eup %1334  ;;  %v825_v32 = vmul.f32 %v1329_v9, %v824_v40  ;;  %vm829_vm5 = vmor %vm827_vm12, %vm828_vm3 }
 0x17c   : > { %v1785_v52 = vadd.f32 1.0, %v1333_v44  ;;  %1336 = vpow2.f32 %v1223_v42  ;;  %v1220_v53 = vmul.f32 -1.442695, %v629_v43  ;;  %vm843_vm4 = vweird.f32 %v1331_v27 }
 0x17d   : > { %v840_v54 = vmul.f32 %v1331_v27, %v839_v45  ;;  %v860_v55 = vsel %vm1776_vm2, %v1728_v5, %v856_v47  ;;  %v868_v46 = vmul.f32 %v1335_v50, %v1737_v14  ;;  %v826_v56 = vadd.f32 %v1329_v9, %v825_v32  ;;  %vm844_vm7 = vmor %vm842_vm13, %vm843_vm4 }
 0x17e   : > { %v865_v24 = vsel %vm1745_vm11, %v864_v21, %v860_v55  ;;  %1338 = vrcp.f32 %v1785_v52  ;;  %v631_v58 = vadd.f32 %v630_v49, %v1693_v36  ;;  %vm873_vm6 = vweird.f32 %v1335_v50  ;;  %v665_v55 = vld [vmem:[%s1646_s26 + $0x68] sm:$0xff] }
 0x17f   : > { %v841_v60 = vadd.f32 %v1331_v27, %v840_v54  ;;  %v869_v63 = vsub.f32 1.0, %v868_v46  ;;  %v980_v0 = vmul.f32 %v865_v24, %v660_v51  ;;  %v830_v1 = vsel %vm829_vm5, %v1329_v9, %v826_v56  ;;  %vm1815_vm9 = vmor %vm872_vm1, %vm873_vm6 }
 0x180   : > { %v849_v3 = vor.u32 1.1754944e-38, %v848_v31  ;;  %1340 = vpow2.f32 %v1220_v53  ;;  %v1221_v4 = vmul.f32 -1.442695, %v648_v48  ;;  %v835_v5 = vsel %vm1757_vm15, %v834_v23, %v830_v1 }
 0x181   : > { %v845_v6 = vsel %vm844_vm7, %v1331_v27, %v841_v60  ;;  %v870_v57 = vmul.f32 %v1335_v50, %v869_v63  ;;  %vm1805_vm8 = vcmp.eq.f32.partialorder %v876_v39, 8.507059e+37  ;;  %996 = vst [vmem:[%s1675_s22 + $0x40] sm:$0xff] %v980_v0  ;;  %v978_v62 = vmul.f32 %v835_v5, %v658_v59 }
 0x182   : > { %v1337_v8 = vpop.eup %1336  ;;  %v850_v10 = vsel %vm1764_vm0, %v849_v3, %v845_v6  ;;  %v879_v12 = vor.u32 1.1754944e-38, %v878_v37  ;;  %1342 = vpow2.f32 %v1221_v4  ;;  %v1224_v17 = vmul.f32 -1.442695, %v631_v58  ;;  %v662_v6 = vld [vmem:[%s1646_s26 + $0x50] sm:$0xff] }
 0x183   : > { %v979_v13 = vmul.f32 %v850_v10, %v659_v2  ;;  %v871_v15 = vadd.f32 %v1335_v50, %v870_v57  ;;  %v729_v16 = vadd.f32 1.0, %v1337_v8  ;;  %994 = vst [vmem:[%s1675_s22 + $0x30] sm:$0xff] %v978_v62  ;;  %v650_v20 = vadd.f32 %v649_v61, %v1693_v36 }
 0x184   : > { %v1339_v18 = vpop.eup %1338  ;;  %v923_v36 = vand.u32 2147483648, %v1785_v52  ;;  %v921_v30 = vand.u32 2147483647, %v1785_v52  ;;  %vm917_vm11 = vweird.f32 %v1785_v52 }
 0x185   : > { %995 = vst [vmem:[%s1675_s22 + $0x38] sm:$0xff] %v979_v13  ;;  %v875_v14 = vsel %vm1815_vm9, %v1335_v50, %v871_v15  ;;  %v913_v21 = vmul.f32 %v1339_v18, %v1785_v52  ;;  %1344 = vrcp.f32 %v729_v16  ;;  %v1225_v28 = vmul.f32 -1.442695, %v650_v20  ;;  %v663_v15 = vld [vmem:[%s1646_s26 + $0x58] sm:$0xff] }
 0x186   : > { %v1341_v9 = vpop.eup %1340  ;;  %v880_v22 = vsel %vm1805_vm8, %v879_v12, %v875_v14  ;;  %1346 = vpow2.f32 %v1224_v17  ;;  %vm918_vm10 = vweird.f32 %v1339_v18  ;;  %v924_v38 = vor.u32 1.1754944e-38, %v923_v36 }
 0x187   : > { %v981_v23 = vmul.f32 %v880_v22, %v661_v19  ;;  %v914_v25 = vsub.f32 1.0, %v913_v21  ;;  %v1828_v26 = vadd.f32 1.0, %v1341_v9  ;;  %vm919_vm12 = vmor %vm917_vm11, %vm918_vm10  ;;  %vm922_vm13 = vcmp.eq.f32.partialorder %v921_v30, 8.507059e+37 }
 0x188   : > { %v1343_v27 = vpop.eup %1342  ;;  %v936_v43 = vand.u32 2147483647, %v729_v16  ;;  %v938_v48 = vand.u32 2147483648, %v729_v16  ;;  %vm932_vm15 = vweird.f32 %v729_v16 }
 0x189   : > { %997 = vst [vmem:[%s1675_s22 + $0x48] sm:$0xff] %v981_v23  ;;  %v915_v29 = vmul.f32 %v1339_v18, %v914_v25  ;;  %1348 = vrcp.f32 %v1828_v26  ;;  %v1834_v31 = vadd.f32 1.0, %v1343_v27  ;;  %v891_v56 = vand.u32 2147483647, %v1828_v26  ;;  %v666_v25 = vld [vmem:[%s1646_s26 + $0x70] sm:$0xff] }
 0x18a   : > { %1350 = vpow2.f32 %v1225_v28  ;;  %vm937_vm0 = vcmp.eq.f32.partialorder %v936_v43, 8.507059e+37  ;;  %v939_v46 = vor.u32 1.1754944e-38, %v938_v48  ;;  %v893_v24 = vand.u32 2147483648, %v1828_v26  ;;  %v1034_v43 = vld [vmem:[%s1675_s22 + $0x18] sm:$0xff] (%p1503_p6) }
 0x18b   : > { %v1345_v33 = vpop.eup %1344  ;;  %v916_v34 = vadd.f32 %v1339_v18, %v915_v29  ;;  %1352 = vrcp.f32 %v1834_v31  ;;  %v906_v1 = vand.u32 2147483647, %v1834_v31  ;;  %vm887_vm3 = vweird.f32 %v1828_v26  ;;  %1035 = vst [vmem:[%s1015_s12 + $0x18] sm:$0xff] (%p1503_p6), %v1034_v43 }
 0x18c   : > { %v928_v39 = vmul.f32 %v1345_v33, %v729_v16  ;;  %v1347_v40 = vpop.eup %1346  ;;  %vm933_vm14 = vweird.f32 %v1345_v33  ;;  %v908_v5 = vand.u32 2147483648, %v1834_v31  ;;  %v894_v57 = vor.u32 1.1754944e-38, %v893_v24  ;;  %v1042_v48 = vld [vmem:[%s1675_s22 + $0x38] sm:$0xff] (%p1503_p6) }
 0x18d   : > { %v920_v41 = vsel %vm919_vm12, %v1339_v18, %v916_v34  ;;  %v1839_v44 = vadd.f32 1.0, %v1347_v40  ;;  %vm934_vm1 = vmor %vm932_vm15, %vm933_vm14  ;;  %vm892_vm6 = vcmp.eq.f32.partialorder %v891_v56, 8.507059e+37  ;;  %vm902_vm7 = vweird.f32 %v1834_v31  ;;  %v667_v34 = vld [vmem:[%s1646_s26 + $0x78] sm:$0xff]  ;;  %1043 = vst [vmem:[%s1015_s12 + $0x58] sm:$0xff] (%p1503_p6), %v1042_v48 }
 0x18e   : > { %v925_v37 = vsel %vm922_vm13, %v924_v38, %v920_v41  ;;  %v929_v42 = vsub.f32 1.0, %v928_v39  ;;  %vm907_vm8 = vcmp.eq.f32.partialorder %v906_v1, 8.507059e+37  ;;  %v909_v16 = vor.u32 1.1754944e-38, %v908_v5  ;;  %v1028_v41 = vld [vmem:[%s1675_s22] sm:$0xff] (%p1503_p6) }
 0x18f   : > { %v1349_v45 = vpop.eup %1348  ;;  %v984_v47 = vmul.f32 %v925_v37, %v664_v35  ;;  %1354 = vrcp.f32 %v1839_v44  ;;  %v951_v17 = vand.u32 2147483647, %v1839_v44  ;;  %v953_v18 = vand.u32 2147483648, %v1839_v44  ;;  %v1030_v37 = vld [vmem:[%s1675_s22 + $0x8] sm:$0xff] (%p1503_p6)  ;;  %1029 = vst [vmem:[%s1015_s12] sm:$0xff] (%p1503_p6), %v1028_v41 }
 0x190   : > { %v1351_v49 = vpop.eup %1350  ;;  %v930_v50 = vmul.f32 %v1345_v33, %v929_v42  ;;  %v883_v32 = vmul.f32 %v1349_v45, %v1828_v26  ;;  %vm888_vm2 = vweird.f32 %v1349_v45  ;;  %vm947_vm11 = vweird.f32 %v1839_v44  ;;  %v1032_v42 = vld [vmem:[%s1675_s22 + $0x10] sm:$0xff] (%p1503_p6)  ;;  %1031 = vst [vmem:[%s1015_s12 + $0x8] sm:$0xff] (%p1503_p6), %v1030_v37 }
 0x191   : > { %1000 = vst [vmem:[%s1675_s22 + $0x60] sm:$0xff] %v984_v47  ;;  %v1844_v51 = vadd.f32 1.0, %v1351_v49  ;;  %v1353_v52 = vpop.eup %1352  ;;  %vm889_vm4 = vmor %vm887_vm3, %vm888_vm2  ;;  %vm952_vm13 = vcmp.eq.f32.partialorder %v951_v17, 8.507059e+37  ;;  %v954_v26 = vor.u32 1.1754944e-38, %v953_v18  ;;  %v1040_v47 = vld [vmem:[%s1675_s22 + $0x30] sm:$0xff] (%p1503_p6)  ;;  %v1044_v49 = vld [vmem:[%s1675_s22 + $0x40] sm:$0xff] (%p1503_p6) }
 0x192   : > { %v931_v53 = vadd.f32 %v1345_v33, %v930_v50  ;;  %v884_v54 = vsub.f32 1.0, %v883_v32  ;;  %v898_v58 = vmul.f32 %v1353_v52, %v1834_v31  ;;  %vm903_vm5 = vweird.f32 %v1353_v52  ;;  %1033 = vst [vmem:[%s1015_s12 + $0x10] sm:$0xff] (%p1503_p6), %v1032_v42  ;;  %v1046_v50 = vld [vmem:[%s1675_s22 + $0x48] sm:$0xff] (%p1503_p6) }
 0x193   : > { %1356 = vrcp.f32 %v1844_v51  ;;  %vm904_vm9 = vmor %vm902_vm7, %vm903_vm5  ;;  %v968_v27 = vand.u32 2147483648, %v1844_v51  ;;  %v966_v29 = vand.u32 2147483647, %v1844_v51  ;;  %vm962_vm15 = vweird.f32 %v1844_v51  ;;  %1041 = vst [vmem:[%s1015_s12 + $0x50] sm:$0xff] (%p1503_p6), %v1040_v47 }
 0x194   : > { %v935_v59 = vsel %vm934_vm1, %v1345_v33, %v931_v53  ;;  %v885_v60 = vmul.f32 %v1349_v45, %v884_v54  ;;  %v899_v0 = vsub.f32 1.0, %v898_v58  ;;  %1045 = vst [vmem:[%s1015_s12 + $0x80] sm:$0xff] (%p1503_p6), %v1044_v49 }
 0x195   : > { %v940_v63 = vsel %vm937_vm0, %v939_v46, %v935_v59  ;;  %v1355_v2 = vpop.eup %1354  ;;  %v969_v35 = vor.u32 1.1754944e-38, %v968_v27  ;;  %vm967_vm1 = vcmp.eq.f32.partialorder %v966_v29, 8.507059e+37  ;;  %1047 = vst [vmem:[%s1015_s12 + $0x88] sm:$0xff] (%p1503_p6), %v1046_v50 }
 0x196   : > { %v985_v3 = vmul.f32 %v940_v63, %v665_v55  ;;  %v886_v4 = vadd.f32 %v1349_v45, %v885_v60  ;;  %v900_v7 = vmul.f32 %v1353_v52, %v899_v0  ;;  %v943_v61 = vmul.f32 %v1355_v2, %v1839_v44  ;;  %v1036_v44 = vld [vmem:[%s1675_s22 + $0x20] sm:$0xff] (%p1503_p6) }
 0x197   : > { %vm948_vm10 = vweird.f32 %v1355_v2  ;;  %1037 = vst [vmem:[%s1015_s12 + $0x40] sm:$0xff] (%p1503_p6), %v1036_v44 }
 0x198   : > { %1001 = vst [vmem:[%s1675_s22 + $0x68] sm:$0xff] %v985_v3  ;;  %v890_v8 = vsel %vm889_vm4, %v1349_v45, %v886_v4  ;;  %v901_v10 = vadd.f32 %v1353_v52, %v900_v7  ;;  %v944_v11 = vsub.f32 1.0, %v943_v61  ;;  %vm949_vm12 = vmor %vm947_vm11, %vm948_vm10  ;;  %v1038_v45 = vld [vmem:[%s1675_s22 + $0x28] sm:$0xff] (%p1503_p6) }
 0x199   : > { %v895_v62 = vsel %vm892_vm6, %v894_v57, %v890_v8  ;;  %v1357_v12 = vpop.eup %1356  ;;  %1039 = vst [vmem:[%s1015_s12 + $0x48] sm:$0xff] (%p1503_p6), %v1038_v45 }
 0x19a   : > { %v982_v13 = vmul.f32 %v895_v62, %v662_v6  ;;  %v905_v19 = vsel %vm904_vm9, %v1353_v52, %v901_v10  ;;  %v945_v20 = vmul.f32 %v1355_v2, %v944_v11  ;;  %v958_v14 = vmul.f32 %v1357_v12, %v1844_v51  ;;  %v1052_v52 = vld [vmem:[%s1675_s22 + $0x60] sm:$0xff] (%p1503_p6) }
 0x19b   : > { %v910_v21 = vsel %vm907_vm8, %v909_v16, %v905_v19  ;;  %vm963_vm14 = vweird.f32 %v1357_v12  ;;  %1053 = vst [vmem:[%s1015_s12 + $0xc0] sm:$0xff] (%p1503_p6), %v1052_v52 }
 0x19c   : > { %998 = vst [vmem:[%s1675_s22 + $0x50] sm:$0xff] %v982_v13  ;;  %v983_v9 = vmul.f32 %v910_v21, %v663_v15  ;;  %v946_v22 = vadd.f32 %v1355_v2, %v945_v20  ;;  %v959_v23 = vsub.f32 1.0, %v958_v14  ;;  %vm964_vm0 = vmor %vm962_vm15, %vm963_vm14 }
 0x19e   : > { %999 = vst [vmem:[%s1675_s22 + $0x58] sm:$0xff] %v983_v9  ;;  %v950_v36 = vsel %vm949_vm12, %v1355_v2, %v946_v22  ;;  %v960_v28 = vmul.f32 %v1357_v12, %v959_v23 }
 0x19f   : > { %v955_v30 = vsel %vm952_vm13, %v954_v26, %v950_v36  ;;  %v1054_v53 = vld [vmem:[%s1675_s22 + $0x68] sm:$0xff] (%p1503_p6) }
 0x1a0   : > { %v986_v31 = vmul.f32 %v955_v30, %v666_v25  ;;  %v961_v33 = vadd.f32 %v1357_v12, %v960_v28  ;;  %1055 = vst [vmem:[%s1015_s12 + $0xc8] sm:$0xff] (%p1503_p6), %v1054_v53 }
 0x1a2   : > { %1002 = vst [vmem:[%s1675_s22 + $0x70] sm:$0xff] %v986_v31  ;;  %v965_v38 = vsel %vm964_vm0, %v1357_v12, %v961_v33  ;;  %1010 = sbr.rel (!%p1503_p6) target bundleno = 431 (0x1af), region = 75 }
 0x1a3   : > { %v970_v39 = vsel %vm967_vm1, %v969_v35, %v965_v38  ;;  %v1048_v32 = vld [vmem:[%s1675_s22 + $0x50] sm:$0xff] (%p1503_p6) }
 0x1a4   : > { %v987_v40 = vmul.f32 %v970_v39, %v667_v34  ;;  %1049 = vst [vmem:[%s1015_s12 + $0x90] sm:$0xff] (%p1503_p6), %v1048_v32 }
 0x1a5   : > { %v1050_v51 = vld [vmem:[%s1675_s22 + $0x58] sm:$0xff] (%p1503_p6) }
 0x1a6   : > { %1003 = vst [vmem:[%s1675_s22 + $0x78] sm:$0xff] %v987_v40 }
 0x1a7   : > { %1051 = vst [vmem:[%s1015_s12 + $0x98] sm:$0xff] %v1050_v51 }
 0x1a9   : > { %v1056_v54 = vld [vmem:[%s1675_s22 + $0x70] sm:$0xff] }
 0x1aa   : > { %1057 = vst [vmem:[%s1015_s12 + $0xd0] sm:$0xff] %v1056_v54 }
 0x1ad   : > { %v1058_v55 = vld [vmem:[%s1675_s22 + $0x78] sm:$0xff] }
 0x1ae   : > { %1059 = vst [vmem:[%s1015_s12 + $0xd8] sm:$0xff] %v1058_v55 }
 0x1af PF: > { %s17_s30 = sadd.s32 1, %s1412_s30   ;;  %s1949_s24 = smov %s1392_s25 }
 0x1b0   : > { %p14_p0 = scmp.ge.s32.totalorder %s17_s30, 6   ;;  %s1950_s25 = smov %s1511_s16 }
 0x1b1   : > { %s1951_s26 = smov %s1404_s28  ;;  %s1952_s27 = smov %s1408_s29 }
 0x1b2   : > { %s1953_s28 = smov %s1956_s8  ;;  %s1954_s29 = smov %s1960_s9 }
 0x1b3   :  { %16 = sbr.rel (!%p14_p0) target bundleno = 4 (0x4), region = 135 }

</bundles_post_ra>
